<compile_context>
chip_gen: v7x
topology: tpu7x:2x2x1
jax: 0.10.0
libtpu: 0.0.40
codegen_flags: <defaults>
</compile_context>

<pallas_src>
import functools
import math

import jax
import jax.numpy as jnp
from jax.experimental import pallas as pl
from jax.experimental.pallas import tpu as pltpu

EPS = 1e-5  # nn.LayerNorm default


def _layernorm(x, gamma, beta):
    mu = jnp.mean(x, axis=-1, keepdims=True)
    var = jnp.mean(jnp.square(x - mu), axis=-1, keepdims=True)
    return (x - mu) * jax.lax.rsqrt(var + EPS) * gamma + beta


def encoder_layer_kernel(x_ref,
                         wq_ref, bq_ref, wk_ref, bk_ref, wv_ref, bv_ref,
                         wo_ref, bo_ref,
                         w1_ref, b1_ref, w2_ref, b2_ref,
                         g1_ref, be1_ref, g2_ref, be2_ref,
                         gf_ref, bf_ref,
                         o_ref,
                         resid_ref,
                         *, n_heads, apply_final_norm):
    """One EncoderLayer per grid step; residual stream carried in VMEM scratch."""
    l = pl.program_id(1)
    nl = pl.num_programs(1)

    # Load the input activations into the resident residual stream at the first layer.
    @pl.when(l == 0)
    def _():
        resid_ref[...] = x_ref[0].astype(jnp.float32)

    x = resid_ref[...]                       # (L, D) f32 residual stream
    L, D = x.shape
    H = n_heads
    E = D // H

    x_bf = x.astype(jnp.bfloat16)

    # ---------- multi-head full self-attention ----------
    # Fused full-width projections: N = K = D (full MXU lane/depth occupancy).
    # wq/bq already carry the 1/sqrt(E) softmax scale (folded wrapper-side).
    q = jnp.dot(x_bf, wq_ref[...], preferred_element_type=jnp.float32) + bq_ref[...]
    k = jnp.dot(x_bf, wk_ref[...], preferred_element_type=jnp.float32) + bk_ref[...]
    v = jnp.dot(x_bf, wv_ref[...], preferred_element_type=jnp.float32) + bv_ref[...]

    # Head-batched attention over an (H, L, E) view (single relayout per tensor,
    # instead of H sub-128-lane slices / per-head matmuls).
    qh = jnp.swapaxes(q.reshape(L, H, E), 0, 1).astype(jnp.bfloat16)   # (H, L, E)
    kh = jnp.swapaxes(k.reshape(L, H, E), 0, 1).astype(jnp.bfloat16)
    vh = jnp.swapaxes(v.reshape(L, H, E), 0, 1).astype(jnp.bfloat16)

    s = jnp.einsum('hqe,hke->hqk', qh, kh,
                   preferred_element_type=jnp.float32)                 # (H, L, L) f32
    s = s - jnp.max(s, axis=-1, keepdims=True)
    p = jnp.exp(s)                                                     # f32 softmax stats
    denom = jnp.sum(p, axis=-1, keepdims=True)                         # (H, L, 1)
    p = (p * pl.reciprocal(denom, approx=True)).astype(jnp.bfloat16)

    ctx = jnp.einsum('hqk,hke->hqe', p, vh,
                     preferred_element_type=jnp.float32)               # (H, L, E)
    ctx = jnp.swapaxes(ctx, 0, 1).reshape(L, D).astype(jnp.bfloat16)   # (L, D)

    # Fused output projection: single K = D matmul over all heads.
    attn = jnp.dot(ctx, wo_ref[...], preferred_element_type=jnp.float32) + bo_ref[...]

    # residual + norm1 (dropout == identity in eval mode)
    x1 = _layernorm(x + attn, g1_ref[...], be1_ref[...])

    # position-wise FFN: conv1(k=1) -> ReLU -> conv2(k=1)
    y = jnp.dot(x1.astype(jnp.bfloat16), w1_ref[...],
                preferred_element_type=jnp.float32) + b1_ref[...]
    y = jnp.maximum(y, 0.0)
    y = jnp.dot(y.astype(jnp.bfloat16), w2_ref[...],
                preferred_element_type=jnp.float32) + b2_ref[...]

    # residual + norm2 -> carry to next layer
    x2 = _layernorm(x1 + y, g2_ref[...], be2_ref[...])
    resid_ref[...] = x2

    @pl.when(l == nl - 1)
    def _():
        out = x2
        if apply_final_norm:
            out = _layernorm(out, gf_ref[...], bf_ref[...])
        o_ref[0] = out.astype(o_ref.dtype)


def _vmem_limit_bytes():
    # v5e/v6e: 128 MiB physical VMEM; v7x: 64 MiB.  Leave headroom, cap at 96 MiB.
    try:
        cap = pltpu.get_tpu_info().vmem_capacity_bytes
    except Exception:
        cap = 64 * 1024 * 1024
    return int(min(cap - 16 * 1024 * 1024, 96 * 1024 * 1024))


def encoder_forward(x, layer_params_list, norm_params, n_heads, attn_mask=None):
    """Encoder.forward: all layers + optional final LayerNorm in one pallas_call."""
    if attn_mask is not None:
        # TODO(synk): masked attention not implemented; Informer encoder FullAttention
        # uses attn_mask=None (mask_flag=False).
        raise NotImplementedError("attn_mask is not supported by this kernel")

    B, L, D = x.shape
    NL = len(layer_params_list)
    E = D // n_heads
    assert E * n_heads == D
    scale = 1.0 / math.sqrt(E)

    def stack(name):
        return jnp.stack([p[name] for p in layer_params_list], axis=0)

    # Full-width lane-dense weights; (in, out) convention for x @ W.
    wq = (stack("wq") * scale).astype(jnp.bfloat16)   # (NL, D, D), scale folded into q
    wk = stack("wk").astype(jnp.bfloat16)
    wv = stack("wv").astype(jnp.bfloat16)
    wo = stack("wo").astype(jnp.bfloat16)
    bq = (stack("bq") * scale).astype(jnp.float32)    # (NL, 1, D)
    bk = stack("bk").astype(jnp.float32)
    bv = stack("bv").astype(jnp.float32)
    bo = stack("bo").astype(jnp.float32)
    w1 = stack("w1").astype(jnp.bfloat16)             # (NL, D, d_ff)
    b1 = stack("b1").astype(jnp.float32)              # (NL, 1, d_ff)
    w2 = stack("w2").astype(jnp.bfloat16)             # (NL, d_ff, D)
    b2 = stack("b2").astype(jnp.float32)              # (NL, 1, D)
    g1 = stack("g1").astype(jnp.float32)
    be1 = stack("be1").astype(jnp.float32)
    g2 = stack("g2").astype(jnp.float32)
    be2 = stack("be2").astype(jnp.float32)

    apply_final_norm = norm_params is not None
    if apply_final_norm:
        gf = norm_params["g"].astype(jnp.float32).reshape(1, D)
        bf = norm_params["b"].astype(jnp.float32).reshape(1, D)
    else:
        gf = jnp.ones((1, D), jnp.float32)
        bf = jnp.zeros((1, D), jnp.float32)

    layer_ws = [wq, bq, wk, bk, wv, bv, wo, bo, w1, b1, w2, b2, g1, be1, g2, be2]

    def per_layer_spec(a):
        # one layer's slab per grid step, indexed by the layer grid axis
        _, r, c = a.shape
        return pl.BlockSpec((None, r, c), lambda b, l: (l, 0, 0))

    norm_spec = pl.BlockSpec((1, D), lambda b, l: (0, 0))

    in_specs = ([pl.BlockSpec((1, L, D), lambda b, l: (b, 0, 0))]
                + [per_layer_spec(a) for a in layer_ws]
                + [norm_spec, norm_spec])

    return pl.pallas_call(
        functools.partial(encoder_layer_kernel,
                          n_heads=n_heads,
                          apply_final_norm=apply_final_norm),
        out_shape=jax.ShapeDtypeStruct((B, L, D), jnp.float32),
        grid_spec=pltpu.PrefetchScalarGridSpec(
            num_scalar_prefetch=0,
            grid=(B, NL),                       # layer axis innermost (sequential)
            in_specs=in_specs,
            out_specs=pl.BlockSpec((1, L, D), lambda b, l: (b, 0, 0)),
            scratch_shapes=[pltpu.VMEM((L, D), jnp.float32)],   # residual stream
        ),
        compiler_params=pltpu.CompilerParams(
            dimension_semantics=("parallel", "arbitrary"),
            vmem_limit_bytes=_vmem_limit_bytes(),
        ),
    )(x, *layer_ws, gf, bf)


def init_layer_params(key, d_model, d_ff):
    ks = jax.random.split(key, 6)
    std = 0.02
    return {
        "wq": jax.random.normal(ks[0], (d_model, d_model), jnp.float32) * std,
        "wk": jax.random.normal(ks[1], (d_model, d_model), jnp.float32) * std,
        "wv": jax.random.normal(ks[2], (d_model, d_model), jnp.float32) * std,
        "wo": jax.random.normal(ks[3], (d_model, d_model), jnp.float32) * std,
        "w1": jax.random.normal(ks[4], (d_model, d_ff), jnp.float32) * std,
        "w2": jax.random.normal(ks[5], (d_ff, d_model), jnp.float32) * std,
        "bq": jnp.zeros((1, d_model), jnp.float32),
        "bk": jnp.zeros((1, d_model), jnp.float32),
        "bv": jnp.zeros((1, d_model), jnp.float32),
        "bo": jnp.zeros((1, d_model), jnp.float32),
        "b1": jnp.zeros((1, d_ff), jnp.float32),
        "b2": jnp.zeros((1, d_model), jnp.float32),
        "g1": jnp.ones((1, d_model), jnp.float32),
        "be1": jnp.zeros((1, d_model), jnp.float32),
        "g2": jnp.ones((1, d_model), jnp.float32),
        "be2": jnp.zeros((1, d_model), jnp.float32),
    }


if __name__ == "__main__":
    # Small but lane-dense demo config (trailing dim D = 128 keeps vregs/outputs unmasked).
    B, L, D, H, DFF = 2, 16, 128, 4, 256
    NUM_LAYERS = 2

    key = jax.random.PRNGKey(0)
    kx, k1, k2 = jax.random.split(key, 3)

    x = jax.random.normal(kx, (B, L, D), jnp.float32)
    layer_params = [init_layer_params(k1, D, DFF), init_layer_params(k2, D, DFF)]
    norm_params = {"g": jnp.ones((1, D), jnp.float32),
                   "b": jnp.zeros((1, D), jnp.float32)}

    out = encoder_forward(x, layer_params, norm_params, n_heads=H, attn_mask=None)
    out = jax.block_until_ready(out)
    assert out.shape == (B, L, D) and out.dtype == jnp.float32
    assert bool(jnp.all(jnp.isfinite(out)))
    print("KERNEL_OK")
</pallas_src>

<mosaic_0001>
module attributes {stable_mosaic.version = 11 : i64} {
  func.func @encoder_layer_kernel(%arg0: i32, %arg1: i32, %arg2: memref<1x16x128xf32, #tpu.memory_space<vmem>>, %arg3: memref<1x128x128xbf16, #tpu.memory_space<vmem>>, %arg4: memref<1x1x128xf32, #tpu.memory_space<vmem>>, %arg5: memref<1x128x128xbf16, #tpu.memory_space<vmem>>, %arg6: memref<1x1x128xf32, #tpu.memory_space<vmem>>, %arg7: memref<1x128x128xbf16, #tpu.memory_space<vmem>>, %arg8: memref<1x1x128xf32, #tpu.memory_space<vmem>>, %arg9: memref<1x128x128xbf16, #tpu.memory_space<vmem>>, %arg10: memref<1x1x128xf32, #tpu.memory_space<vmem>>, %arg11: memref<1x128x256xbf16, #tpu.memory_space<vmem>>, %arg12: memref<1x1x256xf32, #tpu.memory_space<vmem>>, %arg13: memref<1x256x128xbf16, #tpu.memory_space<vmem>>, %arg14: memref<1x1x128xf32, #tpu.memory_space<vmem>>, %arg15: memref<1x1x128xf32, #tpu.memory_space<vmem>>, %arg16: memref<1x1x128xf32, #tpu.memory_space<vmem>>, %arg17: memref<1x1x128xf32, #tpu.memory_space<vmem>>, %arg18: memref<1x1x128xf32, #tpu.memory_space<vmem>>, %arg19: memref<1x128xf32, #tpu.memory_space<vmem>>, %arg20: memref<1x128xf32, #tpu.memory_space<vmem>>, %arg21: memref<1x16x128xf32, #tpu.memory_space<vmem>>, %arg22: memref<16x128xf32, #tpu.memory_space<vmem>>) attributes {dimension_semantics = [#tpu.dimension_semantics<parallel>, #tpu.dimension_semantics<arbitrary>], iteration_bounds = array<i64: 2, 2>, scalar_prefetch = 0 : i64, scratch_operands = 1 : i64, tpu.core_type = #tpu.core_type<tc>, window_params = [{transform_indices = @transform_0, window_bounds = array<i64: 1, 16, 128>}, {transform_indices = @transform_1, window_bounds = array<i64: 1, 128, 128>}, {transform_indices = @transform_2, window_bounds = array<i64: 1, 1, 128>}, {transform_indices = @transform_3, window_bounds = array<i64: 1, 128, 128>}, {transform_indices = @transform_4, window_bounds = array<i64: 1, 1, 128>}, {transform_indices = @transform_5, window_bounds = array<i64: 1, 128, 128>}, {transform_indices = @transform_6, window_bounds = array<i64: 1, 1, 128>}, {transform_indices = @transform_7, window_bounds = array<i64: 1, 128, 128>}, {transform_indices = @transform_8, window_bounds = array<i64: 1, 1, 128>}, {transform_indices = @transform_9, window_bounds = array<i64: 1, 128, 256>}, {transform_indices = @transform_10, window_bounds = array<i64: 1, 1, 256>}, {transform_indices = @transform_11, window_bounds = array<i64: 1, 256, 128>}, {transform_indices = @transform_12, window_bounds = array<i64: 1, 1, 128>}, {transform_indices = @transform_13, window_bounds = array<i64: 1, 1, 128>}, {transform_indices = @transform_14, window_bounds = array<i64: 1, 1, 128>}, {transform_indices = @transform_15, window_bounds = array<i64: 1, 1, 128>}, {transform_indices = @transform_16, window_bounds = array<i64: 1, 1, 128>}, {pipeline_mode = #tpu.pipeline_mode<synchronous>, transform_indices = @transform_17, window_bounds = array<i64: 1, 128>}, {pipeline_mode = #tpu.pipeline_mode<synchronous>, transform_indices = @transform_18, window_bounds = array<i64: 1, 128>}, {transform_indices = @transform_19, window_bounds = array<i64: 1, 16, 128>}]} {
    %c0_i32 = arith.constant 0 : i32
    %0 = arith.cmpi eq, %arg1, %c0_i32 : i32
    %1 = arith.extui %0 : i1 to i32
    %c0_i32_0 = arith.constant 0 : i32
    %2 = arith.cmpi ne, %1, %c0_i32_0 : i32
    scf.if %2 {
      %c0_73 = arith.constant 0 : index
      %c0_74 = arith.constant 0 : index
      %c0_75 = arith.constant 0 : index
      %134 = vector.load %arg2[%c0_73, %c0_74, %c0_75] : memref<1x16x128xf32, #tpu.memory_space<vmem>>, vector<1x16x128xf32>
      %135 = vector.shape_cast %134 : vector<1x16x128xf32> to vector<16x128xf32>
      %c0_76 = arith.constant 0 : index
      %c0_77 = arith.constant 0 : index
      %136 = vector.load %arg22[%c0_76, %c0_77] : memref<16x128xf32, #tpu.memory_space<vmem>>, vector<16x128xf32>
      tpu.vector_store %arg22[%c0_76, %c0_77], %135 {strides = array<i32>} : memref<16x128xf32, #tpu.memory_space<vmem>>, vector<16x128xf32>,
    } else {
    }
    %c0 = arith.constant 0 : index
    %c0_1 = arith.constant 0 : index
    %3 = vector.load %arg22[%c0, %c0_1] : memref<16x128xf32, #tpu.memory_space<vmem>>, vector<16x128xf32>
    %4 = arith.truncf %3 : vector<16x128xf32> to vector<16x128xbf16>
    %c0_2 = arith.constant 0 : index
    %c0_3 = arith.constant 0 : index
    %c0_4 = arith.constant 0 : index
    %5 = vector.load %arg3[%c0_2, %c0_3, %c0_4] : memref<1x128x128xbf16, #tpu.memory_space<vmem>>, vector<1x128x128xbf16>
    %6 = vector.shape_cast %5 : vector<1x128x128xbf16> to vector<128x128xbf16>
    %cst = arith.constant dense<0.000000e+00> : vector<16x128xf32>
    %7 = tpu.matmul %4, %6, %cst {dimension_numbers = #tpu.dot_dimension_numbers<[1], [0], [0], [1], [0, 0, 1, 1], [], []>} : vector<16x128xbf16>, vector<128x128xbf16>, vector<16x128xf32> -> vector<16x128xf32>
    %c0_5 = arith.constant 0 : index
    %c0_6 = arith.constant 0 : index
    %c0_7 = arith.constant 0 : index
    %8 = vector.load %arg4[%c0_5, %c0_6, %c0_7] : memref<1x1x128xf32, #tpu.memory_space<vmem>>, vector<1x1x128xf32>
    %9 = vector.shape_cast %8 : vector<1x1x128xf32> to vector<1x128xf32>
    %10 = vector.broadcast %9 : vector<1x128xf32> to vector<16x128xf32>
    %11 = arith.addf %7, %10 : vector<16x128xf32>
    %c0_8 = arith.constant 0 : index
    %c0_9 = arith.constant 0 : index
    %c0_10 = arith.constant 0 : index
    %12 = vector.load %arg5[%c0_8, %c0_9, %c0_10] : memref<1x128x128xbf16, #tpu.memory_space<vmem>>, vector<1x128x128xbf16>
    %13 = vector.shape_cast %12 : vector<1x128x128xbf16> to vector<128x128xbf16>
    %cst_11 = arith.constant dense<0.000000e+00> : vector<16x128xf32>
    %14 = tpu.matmul %4, %13, %cst_11 {dimension_numbers = #tpu.dot_dimension_numbers<[1], [0], [0], [1], [0, 0, 1, 1], [], []>} : vector<16x128xbf16>, vector<128x128xbf16>, vector<16x128xf32> -> vector<16x128xf32>
    %c0_12 = arith.constant 0 : index
    %c0_13 = arith.constant 0 : index
    %c0_14 = arith.constant 0 : index
    %15 = vector.load %arg6[%c0_12, %c0_13, %c0_14] : memref<1x1x128xf32, #tpu.memory_space<vmem>>, vector<1x1x128xf32>
    %16 = vector.shape_cast %15 : vector<1x1x128xf32> to vector<1x128xf32>
    %17 = vector.broadcast %16 : vector<1x128xf32> to vector<16x128xf32>
    %18 = arith.addf %14, %17 : vector<16x128xf32>
    %c0_15 = arith.constant 0 : index
    %c0_16 = arith.constant 0 : index
    %c0_17 = arith.constant 0 : index
    %19 = vector.load %arg7[%c0_15, %c0_16, %c0_17] : memref<1x128x128xbf16, #tpu.memory_space<vmem>>, vector<1x128x128xbf16>
    %20 = vector.shape_cast %19 : vector<1x128x128xbf16> to vector<128x128xbf16>
    %cst_18 = arith.constant dense<0.000000e+00> : vector<16x128xf32>
    %21 = tpu.matmul %4, %20, %cst_18 {dimension_numbers = #tpu.dot_dimension_numbers<[1], [0], [0], [1], [0, 0, 1, 1], [], []>} : vector<16x128xbf16>, vector<128x128xbf16>, vector<16x128xf32> -> vector<16x128xf32>
    %c0_19 = arith.constant 0 : index
    %c0_20 = arith.constant 0 : index
    %c0_21 = arith.constant 0 : index
    %22 = vector.load %arg8[%c0_19, %c0_20, %c0_21] : memref<1x1x128xf32, #tpu.memory_space<vmem>>, vector<1x1x128xf32>
    %23 = vector.shape_cast %22 : vector<1x1x128xf32> to vector<1x128xf32>
    %24 = vector.broadcast %23 : vector<1x128xf32> to vector<16x128xf32>
    %25 = arith.addf %21, %24 : vector<16x128xf32>
    %26 = vector.shape_cast %11 : vector<16x128xf32> to vector<16x4x32xf32>
    %27 = tpu.transpose %26, [1, 0, 2] : vector<16x4x32xf32> -> vector<4x16x32xf32>
    %28 = arith.truncf %27 : vector<4x16x32xf32> to vector<4x16x32xbf16>
    %29 = vector.shape_cast %18 : vector<16x128xf32> to vector<16x4x32xf32>
    %30 = tpu.transpose %29, [1, 0, 2] : vector<16x4x32xf32> -> vector<4x16x32xf32>
    %31 = arith.truncf %30 : vector<4x16x32xf32> to vector<4x16x32xbf16>
    %32 = vector.shape_cast %25 : vector<16x128xf32> to vector<16x4x32xf32>
    %33 = tpu.transpose %32, [1, 0, 2] : vector<16x4x32xf32> -> vector<4x16x32xf32>
    %34 = arith.truncf %33 : vector<4x16x32xf32> to vector<4x16x32xbf16>
    "tpu.trace_start"() <{level = 10 : i32, message = "hqe,hke->hqk"}> : () -> ()
    %cst_22 = arith.constant dense<0.000000e+00> : vector<4x16x16xf32>
    %35 = tpu.matmul %28, %31, %cst_22 {dimension_numbers = #tpu.dot_dimension_numbers<[2], [2], [1], [1], [0, 0, 0, 1, 1, 1], [0], [0]>} : vector<4x16x32xbf16>, vector<4x16x32xbf16>, vector<4x16x16xf32> -> vector<4x16x16xf32>
    "tpu.trace_stop"() : () -> ()
    %cst_23 = arith.constant dense<0xFF800000> : vector<4x16xf32>
    %36 = vector.multi_reduction <maximumf>, %35, %cst_23 [2] : vector<4x16x16xf32> to vector<4x16xf32>
    %37 = vector.shape_cast %36 : vector<4x16xf32> to vector<4x16x1xf32>
    %38 = vector.broadcast %37 : vector<4x16x1xf32> to vector<4x16x16xf32>
    %39 = arith.subf %35, %38 : vector<4x16x16xf32>
    %40 = math.exp %39 : vector<4x16x16xf32>
    %cst_24 = arith.constant dense<0.000000e+00> : vector<4x16xf32>
    %41 = vector.multi_reduction <add>, %40, %cst_24 [2] : vector<4x16x16xf32> to vector<4x16xf32>
    %42 = vector.shape_cast %41 : vector<4x16xf32> to vector<4x16x1xf32>
    %43 = tpu.reciprocal %42 {approx = true} : vector<4x16x1xf32> -> vector<4x16x1xf32>
    %44 = vector.broadcast %43 : vector<4x16x1xf32> to vector<4x16x16xf32>
    %45 = arith.mulf %40, %44 : vector<4x16x16xf32>
    %46 = arith.truncf %45 : vector<4x16x16xf32> to vector<4x16x16xbf16>
    "tpu.trace_start"() <{level = 10 : i32, message = "hqk,hke->hqe"}> : () -> ()
    %cst_25 = arith.constant dense<0.000000e+00> : vector<4x16x32xf32>
    %47 = tpu.matmul %46, %34, %cst_25 {dimension_numbers = #tpu.dot_dimension_numbers<[2], [1], [1], [2], [0, 0, 0, 1, 1, 2], [0], [0]>} : vector<4x16x16xbf16>, vector<4x16x32xbf16>, vector<4x16x32xf32> -> vector<4x16x32xf32>
    "tpu.trace_stop"() : () -> ()
    %48 = tpu.transpose %47, [1, 0, 2] : vector<4x16x32xf32> -> vector<16x4x32xf32>
    %49 = vector.shape_cast %48 : vector<16x4x32xf32> to vector<16x128xf32>
    %50 = arith.truncf %49 : vector<16x128xf32> to vector<16x128xbf16>
    %c0_26 = arith.constant 0 : index
    %c0_27 = arith.constant 0 : index
    %c0_28 = arith.constant 0 : index
    %51 = vector.load %arg9[%c0_26, %c0_27, %c0_28] : memref<1x128x128xbf16, #tpu.memory_space<vmem>>, vector<1x128x128xbf16>
    %52 = vector.shape_cast %51 : vector<1x128x128xbf16> to vector<128x128xbf16>
    %cst_29 = arith.constant dense<0.000000e+00> : vector<16x128xf32>
    %53 = tpu.matmul %50, %52, %cst_29 {dimension_numbers = #tpu.dot_dimension_numbers<[1], [0], [0], [1], [0, 0, 1, 1], [], []>} : vector<16x128xbf16>, vector<128x128xbf16>, vector<16x128xf32> -> vector<16x128xf32>
    %c0_30 = arith.constant 0 : index
    %c0_31 = arith.constant 0 : index
    %c0_32 = arith.constant 0 : index
    %54 = vector.load %arg10[%c0_30, %c0_31, %c0_32] : memref<1x1x128xf32, #tpu.memory_space<vmem>>, vector<1x1x128xf32>
    %55 = vector.shape_cast %54 : vector<1x1x128xf32> to vector<1x128xf32>
    %56 = vector.broadcast %55 : vector<1x128xf32> to vector<16x128xf32>
    %57 = arith.addf %53, %56 : vector<16x128xf32>
    %58 = arith.addf %3, %57 : vector<16x128xf32>
    %c0_33 = arith.constant 0 : index
    %c0_34 = arith.constant 0 : index
    %c0_35 = arith.constant 0 : index
    %59 = vector.load %arg15[%c0_33, %c0_34, %c0_35] : memref<1x1x128xf32, #tpu.memory_space<vmem>>, vector<1x1x128xf32>
    %60 = vector.shape_cast %59 : vector<1x1x128xf32> to vector<1x128xf32>
    %c0_36 = arith.constant 0 : index
    %c0_37 = arith.constant 0 : index
    %c0_38 = arith.constant 0 : index
    %61 = vector.load %arg16[%c0_36, %c0_37, %c0_38] : memref<1x1x128xf32, #tpu.memory_space<vmem>>, vector<1x1x128xf32>
    %62 = vector.shape_cast %61 : vector<1x1x128xf32> to vector<1x128xf32>
    %cst_39 = arith.constant dense<0.000000e+00> : vector<16xf32>
    %63 = vector.multi_reduction <add>, %58, %cst_39 [1] : vector<16x128xf32> to vector<16xf32>
    %64 = vector.shape_cast %63 : vector<16xf32> to vector<16x1xf32>
    %cst_40 = arith.constant 1.280000e+02 : f32
    %65 = vector.broadcast %cst_40 : f32 to vector<16x1xf32>
    %66 = arith.divf %64, %65 : vector<16x1xf32>
    %67 = vector.broadcast %66 : vector<16x1xf32> to vector<16x128xf32>
    %68 = arith.subf %58, %67 : vector<16x128xf32>
    %69 = arith.mulf %68, %68 : vector<16x128xf32>
    %cst_41 = arith.constant dense<0.000000e+00> : vector<16xf32>
    %70 = vector.multi_reduction <add>, %69, %cst_41 [1] : vector<16x128xf32> to vector<16xf32>
    %71 = vector.shape_cast %70 : vector<16xf32> to vector<16x1xf32>
    %cst_42 = arith.constant 1.280000e+02 : f32
    %72 = vector.broadcast %cst_42 : f32 to vector<16x1xf32>
    %73 = arith.divf %71, %72 : vector<16x1xf32>
    %74 = vector.broadcast %66 : vector<16x1xf32> to vector<16x128xf32>
    %75 = arith.subf %58, %74 : vector<16x128xf32>
    %cst_43 = arith.constant 9.99999974E-6 : f32
    %76 = vector.broadcast %cst_43 : f32 to vector<16x1xf32>
    %77 = arith.addf %73, %76 : vector<16x1xf32>
    %78 = math.rsqrt %77 : vector<16x1xf32>
    %79 = vector.broadcast %78 : vector<16x1xf32> to vector<16x128xf32>
    %80 = arith.mulf %75, %79 : vector<16x128xf32>
    %81 = vector.broadcast %60 : vector<1x128xf32> to vector<16x128xf32>
    %82 = arith.mulf %80, %81 : vector<16x128xf32>
    %83 = vector.broadcast %62 : vector<1x128xf32> to vector<16x128xf32>
    %84 = arith.addf %82, %83 : vector<16x128xf32>
    %85 = arith.truncf %84 : vector<16x128xf32> to vector<16x128xbf16>
    %c0_44 = arith.constant 0 : index
    %c0_45 = arith.constant 0 : index
    %c0_46 = arith.constant 0 : index
    %86 = vector.load %arg11[%c0_44, %c0_45, %c0_46] : memref<1x128x256xbf16, #tpu.memory_space<vmem>>, vector<1x128x256xbf16>
    %87 = vector.shape_cast %86 : vector<1x128x256xbf16> to vector<128x256xbf16>
    %cst_47 = arith.constant dense<0.000000e+00> : vector<16x256xf32>
    %88 = tpu.matmul %85, %87, %cst_47 {dimension_numbers = #tpu.dot_dimension_numbers<[1], [0], [0], [1], [0, 0, 1, 1], [], []>} : vector<16x128xbf16>, vector<128x256xbf16>, vector<16x256xf32> -> vector<16x256xf32>
    %c0_48 = arith.constant 0 : index
    %c0_49 = arith.constant 0 : index
    %c0_50 = arith.constant 0 : index
    %89 = vector.load %arg12[%c0_48, %c0_49, %c0_50] : memref<1x1x256xf32, #tpu.memory_space<vmem>>, vector<1x1x256xf32>
    %90 = vector.shape_cast %89 : vector<1x1x256xf32> to vector<1x256xf32>
    %91 = vector.broadcast %90 : vector<1x256xf32> to vector<16x256xf32>
    %92 = arith.addf %88, %91 : vector<16x256xf32>
    %cst_51 = arith.constant 0.000000e+00 : f32
    %93 = vector.broadcast %cst_51 : f32 to vector<16x256xf32>
    %94 = arith.maximumf %92, %93 : vector<16x256xf32>
    %95 = arith.truncf %94 : vector<16x256xf32> to vector<16x256xbf16>
    %c0_52 = arith.constant 0 : index
    %c0_53 = arith.constant 0 : index
    %c0_54 = arith.constant 0 : index
    %96 = vector.load %arg13[%c0_52, %c0_53, %c0_54] : memref<1x256x128xbf16, #tpu.memory_space<vmem>>, vector<1x256x128xbf16>
    %97 = vector.shape_cast %96 : vector<1x256x128xbf16> to vector<256x128xbf16>
    %cst_55 = arith.constant dense<0.000000e+00> : vector<16x128xf32>
    %98 = tpu.matmul %95, %97, %cst_55 {dimension_numbers = #tpu.dot_dimension_numbers<[1], [0], [0], [1], [0, 0, 1, 1], [], []>} : vector<16x256xbf16>, vector<256x128xbf16>, vector<16x128xf32> -> vector<16x128xf32>
    %c0_56 = arith.constant 0 : index
    %c0_57 = arith.constant 0 : index
    %c0_58 = arith.constant 0 : index
    %99 = vector.load %arg14[%c0_56, %c0_57, %c0_58] : memref<1x1x128xf32, #tpu.memory_space<vmem>>, vector<1x1x128xf32>
    %100 = vector.shape_cast %99 : vector<1x1x128xf32> to vector<1x128xf32>
    %101 = vector.broadcast %100 : vector<1x128xf32> to vector<16x128xf32>
    %102 = arith.addf %98, %101 : vector<16x128xf32>
    %103 = arith.addf %84, %102 : vector<16x128xf32>
    %c0_59 = arith.constant 0 : index
    %c0_60 = arith.constant 0 : index
    %c0_61 = arith.constant 0 : index
    %104 = vector.load %arg17[%c0_59, %c0_60, %c0_61] : memref<1x1x128xf32, #tpu.memory_space<vmem>>, vector<1x1x128xf32>
    %105 = vector.shape_cast %104 : vector<1x1x128xf32> to vector<1x128xf32>
    %c0_62 = arith.constant 0 : index
    %c0_63 = arith.constant 0 : index
    %c0_64 = arith.constant 0 : index
    %106 = vector.load %arg18[%c0_62, %c0_63, %c0_64] : memref<1x1x128xf32, #tpu.memory_space<vmem>>, vector<1x1x128xf32>
    %107 = vector.shape_cast %106 : vector<1x1x128xf32> to vector<1x128xf32>
    %cst_65 = arith.constant dense<0.000000e+00> : vector<16xf32>
    %108 = vector.multi_reduction <add>, %103, %cst_65 [1] : vector<16x128xf32> to vector<16xf32>
    %109 = vector.shape_cast %108 : vector<16xf32> to vector<16x1xf32>
    %cst_66 = arith.constant 1.280000e+02 : f32
    %110 = vector.broadcast %cst_66 : f32 to vector<16x1xf32>
    %111 = arith.divf %109, %110 : vector<16x1xf32>
    %112 = vector.broadcast %111 : vector<16x1xf32> to vector<16x128xf32>
    %113 = arith.subf %103, %112 : vector<16x128xf32>
    %114 = arith.mulf %113, %113 : vector<16x128xf32>
    %cst_67 = arith.constant dense<0.000000e+00> : vector<16xf32>
    %115 = vector.multi_reduction <add>, %114, %cst_67 [1] : vector<16x128xf32> to vector<16xf32>
    %116 = vector.shape_cast %115 : vector<16xf32> to vector<16x1xf32>
    %cst_68 = arith.constant 1.280000e+02 : f32
    %117 = vector.broadcast %cst_68 : f32 to vector<16x1xf32>
    %118 = arith.divf %116, %117 : vector<16x1xf32>
    %119 = vector.broadcast %111 : vector<16x1xf32> to vector<16x128xf32>
    %120 = arith.subf %103, %119 : vector<16x128xf32>
    %cst_69 = arith.constant 9.99999974E-6 : f32
    %121 = vector.broadcast %cst_69 : f32 to vector<16x1xf32>
    %122 = arith.addf %118, %121 : vector<16x1xf32>
    %123 = math.rsqrt %122 : vector<16x1xf32>
    %124 = vector.broadcast %123 : vector<16x1xf32> to vector<16x128xf32>
    %125 = arith.mulf %120, %124 : vector<16x128xf32>
    %126 = vector.broadcast %105 : vector<1x128xf32> to vector<16x128xf32>
    %127 = arith.mulf %125, %126 : vector<16x128xf32>
    %128 = vector.broadcast %107 : vector<1x128xf32> to vector<16x128xf32>
    %129 = arith.addf %127, %128 : vector<16x128xf32>
    %c0_70 = arith.constant 0 : index
    %c0_71 = arith.constant 0 : index
    %130 = vector.load %arg22[%c0_70, %c0_71] : memref<16x128xf32, #tpu.memory_space<vmem>>, vector<16x128xf32>
    tpu.vector_store %arg22[%c0_70, %c0_71], %129 {strides = array<i32>} : memref<16x128xf32, #tpu.memory_space<vmem>>, vector<16x128xf32>,
    %c1_i32 = arith.constant 1 : i32
    %131 = arith.cmpi eq, %arg1, %c1_i32 : i32
    %132 = arith.extui %131 : i1 to i32
    %c0_i32_72 = arith.constant 0 : i32
    %133 = arith.cmpi ne, %132, %c0_i32_72 : i32
    scf.if %133 {
      %c0_73 = arith.constant 0 : index
      %c0_74 = arith.constant 0 : index
      %134 = vector.load %arg19[%c0_73, %c0_74] : memref<1x128xf32, #tpu.memory_space<vmem>>, vector<1x128xf32>
      %c0_75 = arith.constant 0 : index
      %c0_76 = arith.constant 0 : index
      %135 = vector.load %arg20[%c0_75, %c0_76] : memref<1x128xf32, #tpu.memory_space<vmem>>, vector<1x128xf32>
      %cst_77 = arith.constant dense<0.000000e+00> : vector<16xf32>
      %136 = vector.multi_reduction <add>, %129, %cst_77 [1] : vector<16x128xf32> to vector<16xf32>
      %137 = vector.shape_cast %136 : vector<16xf32> to vector<16x1xf32>
      %cst_78 = arith.constant 1.280000e+02 : f32
      %138 = vector.broadcast %cst_78 : f32 to vector<16x1xf32>
      %139 = arith.divf %137, %138 : vector<16x1xf32>
      %140 = vector.broadcast %139 : vector<16x1xf32> to vector<16x128xf32>
      %141 = arith.subf %129, %140 : vector<16x128xf32>
      %142 = arith.mulf %141, %141 : vector<16x128xf32>
      %cst_79 = arith.constant dense<0.000000e+00> : vector<16xf32>
      %143 = vector.multi_reduction <add>, %142, %cst_79 [1] : vector<16x128xf32> to vector<16xf32>
      %144 = vector.shape_cast %143 : vector<16xf32> to vector<16x1xf32>
      %cst_80 = arith.constant 1.280000e+02 : f32
      %145 = vector.broadcast %cst_80 : f32 to vector<16x1xf32>
      %146 = arith.divf %144, %145 : vector<16x1xf32>
      %147 = vector.broadcast %139 : vector<16x1xf32> to vector<16x128xf32>
      %148 = arith.subf %129, %147 : vector<16x128xf32>
      %cst_81 = arith.constant 9.99999974E-6 : f32
      %149 = vector.broadcast %cst_81 : f32 to vector<16x1xf32>
      %150 = arith.addf %146, %149 : vector<16x1xf32>
      %151 = math.rsqrt %150 : vector<16x1xf32>
      %152 = vector.broadcast %151 : vector<16x1xf32> to vector<16x128xf32>
      %153 = arith.mulf %148, %152 : vector<16x128xf32>
      %154 = vector.broadcast %134 : vector<1x128xf32> to vector<16x128xf32>
      %155 = arith.mulf %153, %154 : vector<16x128xf32>
      %156 = vector.broadcast %135 : vector<1x128xf32> to vector<16x128xf32>
      %157 = arith.addf %155, %156 : vector<16x128xf32>
      %c0_82 = arith.constant 0 : index
      %c0_83 = arith.constant 0 : index
      %c0_84 = arith.constant 0 : index
      %158 = vector.load %arg21[%c0_82, %c0_83, %c0_84] : memref<1x16x128xf32, #tpu.memory_space<vmem>>, vector<1x16x128xf32>
      %159 = vector.shape_cast %158 : vector<1x16x128xf32> to vector<16x128xf32>
      %160 = vector.shape_cast %157 : vector<16x128xf32> to vector<1x16x128xf32>
      tpu.vector_store %arg21[%c0_82, %c0_83, %c0_84], %160 {strides = array<i32>} : memref<1x16x128xf32, #tpu.memory_space<vmem>>, vector<1x16x128xf32>,
    } else {
    }
    return
  }
  func.func @transform_0(%arg0: i32, %arg1: i32) -> (i32, i32, i32) {
    %c0_i32 = arith.constant 0 : i32
    %c0_i32_0 = arith.constant 0 : i32
    %c0_i32_1 = arith.constant 0 : i32
    return %arg0, %c0_i32, %c0_i32_0 : i32, i32, i32
  }
  func.func @transform_1(%arg0: i32, %arg1: i32) -> (i32, i32, i32) {
    %c0_i32 = arith.constant 0 : i32
    %c0_i32_0 = arith.constant 0 : i32
    %c0_i32_1 = arith.constant 0 : i32
    return %arg1, %c0_i32, %c0_i32_0 : i32, i32, i32
  }
  func.func @transform_2(%arg0: i32, %arg1: i32) -> (i32, i32, i32) {
    %c0_i32 = arith.constant 0 : i32
    %c0_i32_0 = arith.constant 0 : i32
    %c0_i32_1 = arith.constant 0 : i32
    return %arg1, %c0_i32, %c0_i32_0 : i32, i32, i32
  }
  func.func @transform_3(%arg0: i32, %arg1: i32) -> (i32, i32, i32) {
    %c0_i32 = arith.constant 0 : i32
    %c0_i32_0 = arith.constant 0 : i32
    %c0_i32_1 = arith.constant 0 : i32
    return %arg1, %c0_i32, %c0_i32_0 : i32, i32, i32
  }
  func.func @transform_4(%arg0: i32, %arg1: i32) -> (i32, i32, i32) {
    %c0_i32 = arith.constant 0 : i32
    %c0_i32_0 = arith.constant 0 : i32
    %c0_i32_1 = arith.constant 0 : i32
    return %arg1, %c0_i32, %c0_i32_0 : i32, i32, i32
  }
  func.func @transform_5(%arg0: i32, %arg1: i32) -> (i32, i32, i32) {
    %c0_i32 = arith.constant 0 : i32
    %c0_i32_0 = arith.constant 0 : i32
    %c0_i32_1 = arith.constant 0 : i32
    return %arg1, %c0_i32, %c0_i32_0 : i32, i32, i32
  }
  func.func @transform_6(%arg0: i32, %arg1: i32) -> (i32, i32, i32) {
    %c0_i32 = arith.constant 0 : i32
    %c0_i32_0 = arith.constant 0 : i32
    %c0_i32_1 = arith.constant 0 : i32
    return %arg1, %c0_i32, %c0_i32_0 : i32, i32, i32
  }
  func.func @transform_7(%arg0: i32, %arg1: i32) -> (i32, i32, i32) {
    %c0_i32 = arith.constant 0 : i32
    %c0_i32_0 = arith.constant 0 : i32
    %c0_i32_1 = arith.constant 0 : i32
    return %arg1, %c0_i32, %c0_i32_0 : i32, i32, i32
  }
  func.func @transform_8(%arg0: i32, %arg1: i32) -> (i32, i32, i32) {
    %c0_i32 = arith.constant 0 : i32
    %c0_i32_0 = arith.constant 0 : i32
    %c0_i32_1 = arith.constant 0 : i32
    return %arg1, %c0_i32, %c0_i32_0 : i32, i32, i32
  }
  func.func @transform_9(%arg0: i32, %arg1: i32) -> (i32, i32, i32) {
    %c0_i32 = arith.constant 0 : i32
    %c0_i32_0 = arith.constant 0 : i32
    %c0_i32_1 = arith.constant 0 : i32
    return %arg1, %c0_i32, %c0_i32_0 : i32, i32, i32
  }
  func.func @transform_10(%arg0: i32, %arg1: i32) -> (i32, i32, i32) {
    %c0_i32 = arith.constant 0 : i32
    %c0_i32_0 = arith.constant 0 : i32
    %c0_i32_1 = arith.constant 0 : i32
    return %arg1, %c0_i32, %c0_i32_0 : i32, i32, i32
  }
  func.func @transform_11(%arg0: i32, %arg1: i32) -> (i32, i32, i32) {
    %c0_i32 = arith.constant 0 : i32
    %c0_i32_0 = arith.constant 0 : i32
    %c0_i32_1 = arith.constant 0 : i32
    return %arg1, %c0_i32, %c0_i32_0 : i32, i32, i32
  }
  func.func @transform_12(%arg0: i32, %arg1: i32) -> (i32, i32, i32) {
    %c0_i32 = arith.constant 0 : i32
    %c0_i32_0 = arith.constant 0 : i32
    %c0_i32_1 = arith.constant 0 : i32
    return %arg1, %c0_i32, %c0_i32_0 : i32, i32, i32
  }
  func.func @transform_13(%arg0: i32, %arg1: i32) -> (i32, i32, i32) {
    %c0_i32 = arith.constant 0 : i32
    %c0_i32_0 = arith.constant 0 : i32
    %c0_i32_1 = arith.constant 0 : i32
    return %arg1, %c0_i32, %c0_i32_0 : i32, i32, i32
  }
  func.func @transform_14(%arg0: i32, %arg1: i32) -> (i32, i32, i32) {
    %c0_i32 = arith.constant 0 : i32
    %c0_i32_0 = arith.constant 0 : i32
    %c0_i32_1 = arith.constant 0 : i32
    return %arg1, %c0_i32, %c0_i32_0 : i32, i32, i32
  }
  func.func @transform_15(%arg0: i32, %arg1: i32) -> (i32, i32, i32) {
    %c0_i32 = arith.constant 0 : i32
    %c0_i32_0 = arith.constant 0 : i32
    %c0_i32_1 = arith.constant 0 : i32
    return %arg1, %c0_i32, %c0_i32_0 : i32, i32, i32
  }
  func.func @transform_16(%arg0: i32, %arg1: i32) -> (i32, i32, i32) {
    %c0_i32 = arith.constant 0 : i32
    %c0_i32_0 = arith.constant 0 : i32
    %c0_i32_1 = arith.constant 0 : i32
    return %arg1, %c0_i32, %c0_i32_0 : i32, i32, i32
  }
  func.func @transform_17(%arg0: i32, %arg1: i32) -> (i32, i32) {
    %c0_i32 = arith.constant 0 : i32
    %c0_i32_0 = arith.constant 0 : i32
    %c0_i32_1 = arith.constant 0 : i32
    return %c0_i32, %c0_i32_0 : i32, i32
  }
  func.func @transform_18(%arg0: i32, %arg1: i32) -> (i32, i32) {
    %c0_i32 = arith.constant 0 : i32
    %c0_i32_0 = arith.constant 0 : i32
    %c0_i32_1 = arith.constant 0 : i32
    return %c0_i32, %c0_i32_0 : i32, i32
  }
  func.func @transform_19(%arg0: i32, %arg1: i32) -> (i32, i32, i32) {
    %c0_i32 = arith.constant 0 : i32
    %c0_i32_0 = arith.constant 0 : i32
    %c0_i32_1 = arith.constant 0 : i32
    return %arg0, %c0_i32, %c0_i32_0 : i32, i32, i32
  }
}

</mosaic_0001>

<bundles_post_ra>
// kernel: tpu_custom_call.1
= control target key start
LH: loop header
LB: loop body
LE: loop exit
PB: predicated region body
PF: predicated region fallthrough
CT: control target
= control target key end

     0   :  { %s6072_s0 = inlined_call_operand.hbm [shape: f32[2,16,128], index: 0, kind: input, shape index: {}]   ;;  %s6073_s1 = inlined_call_operand.hbm [shape: bf16[2,128,128], index: 1, kind: input, shape index: {}]   ;;  %s6074_s2 = inlined_call_operand.vmem [shape: f32[2,1,128], index: 2, kind: input, shape index: {}]   ;;  %s6075_s3 = inlined_call_operand.hbm [shape: bf16[2,128,128], index: 3, kind: input, shape index: {}]   ;;  %s6076_s4 = inlined_call_operand.vmem [shape: f32[2,1,128], index: 4, kind: input, shape index: {}]   ;;  %s6077_s5 = inlined_call_operand.hbm [shape: bf16[2,128,128], index: 5, kind: input, shape index: {}]   ;;  %s6078_s6 = inlined_call_operand.vmem [shape: f32[2,1,128], index: 6, kind: input, shape index: {}]   ;;  %s6079_s7 = inlined_call_operand.hbm [shape: bf16[2,128,128], index: 7, kind: input, shape index: {}]   ;;  %s6080_s8 = inlined_call_operand.vmem [shape: f32[2,1,128], index: 8, kind: input, shape index: {}]   ;;  %s6081_s9 = inlined_call_operand.hbm [shape: bf16[2,128,256], index: 9, kind: input, shape index: {}]   ;;  %s6082_s10 = inlined_call_operand.vmem [shape: f32[2,1,256], index: 10, kind: input, shape index: {}]   ;;  %s6083_s11 = inlined_call_operand.hbm [shape: bf16[2,256,128], index: 11, kind: input, shape index: {}]   ;;  %s6084_s12 = inlined_call_operand.vmem [shape: f32[2,1,128], index: 12, kind: input, shape index: {}]   ;;  %s6085_s13 = inlined_call_operand.vmem [shape: f32[2,1,128], index: 13, kind: input, shape index: {}]   ;;  %s6086_s14 = inlined_call_operand.vmem [shape: f32[2,1,128], index: 14, kind: input, shape index: {}]   ;;  %s6087_s15 = inlined_call_operand.vmem [shape: f32[2,1,128], index: 15, kind: input, shape index: {}]   ;;  %s6088_s16 = inlined_call_operand.vmem [shape: f32[2,1,128], index: 16, kind: input, shape index: {}]   ;;  %s6089_s17 = inlined_call_operand.vmem [shape: f32[1,128], index: 17, kind: input, shape index: {}]   ;;  %s6090_s18 = inlined_call_operand.vmem [shape: f32[1,128], index: 18, kind: input, shape index: {}]   ;;  %s6091_s19 = inlined_call_operand.hbm [shape: f32[2,16,128], index: 19, kind: output, shape index: {}]  }
   0x1   :  { %6140 = sst [smem:[#allocation42_spill]] %s6072_s0 }
   0x2   :  { %6141 = sst [smem:[#allocation43_spill]] %s6073_s1 }
   0x3   :  { %6142 = sst [smem:[#allocation44_spill]] %s6074_s2 }
   0x4   :  { %6143 = sst [smem:[#allocation45_spill]] %s6075_s3 }
   0x5   :  { %6144 = sst [smem:[#allocation46_spill]] %s6076_s4 }
   0x6   :  { %6145 = sst [smem:[#allocation47_spill]] %s6077_s5 }
   0x7   :  { %6146 = sst [smem:[#allocation48_spill]] %s6078_s6 }
   0x8   :  { %6147 = sst [smem:[#allocation49_spill]] %s6079_s7 }
   0x9   :  { %6148 = sst [smem:[#allocation50_spill]] %s6080_s8 }
   0xa   :  { %6149 = sst [smem:[#allocation51_spill]] %s6081_s9 }
   0xb   :  { %6150 = sst [smem:[#allocation52_spill]] %s6082_s10 }
   0xc   :  { %6151 = sst [smem:[#allocation53_spill]] %s6083_s11 }
   0xd   :  { %6152 = sst [smem:[#allocation54_spill]] %s6084_s12 }
   0xe   :  { %6153 = sst [smem:[#allocation55_spill]] %s6085_s13 }
   0xf   :  { %6154 = sst [smem:[#allocation56_spill]] %s6086_s14 }
  0x10   :  { %6155 = sst [smem:[#allocation57_spill]] %s6087_s15 }
  0x11   :  { %6156 = sst [smem:[#allocation58_spill]] %s6088_s16 }
  0x12   :  { %6157 = sst [smem:[#allocation59_spill]] %s6089_s17 }
  0x13   :  { %6158 = sst [smem:[#allocation60_spill]] %s6090_s18 }
  0x14   :  { %6159 = sst [smem:[#allocation61_spill]] %s6091_s19 }
  0x15   :  { %24 = vsyncpa [#allocation4], 0 }
  0x16   :  { %26 = vsyncpa [#allocation4 + $0x1], 0 }
  0x17   :  { %27 = vsyncpa [#allocation7], 0 }
  0x18   :  { %29 = vsyncpa [#allocation7 + $0x1], 0 }
  0x19   :  { %30 = vsyncpa [#allocation10], 0 }
  0x1a   :  { %32 = vsyncpa [#allocation10 + $0x1], 0 }
  0x1b   :  { %33 = vsyncpa [#allocation13], 0 }
  0x1c   :  { %35 = vsyncpa [#allocation13 + $0x1], 0 }
  0x1d   :  { %36 = vsyncpa [#allocation5], 0 }
  0x1e   :  { %38 = vsyncpa [#allocation5 + $0x1], 0  ;;  %s5003_s0 = smov 0   ;;  %s5005_s30 = smov 0  }
  0x1f   :  { %s5007_s20 = smov 0   ;;  %s5009_s21 = smov 0  }
  0x20   :  { %s5011_s1 = smov 0   ;;  %s5013_s22 = smov 0  }
  0x21   :  { %s5015_s2 = smov 0   ;;  %s5017_s23 = smov 0  }
  0x22   :  { %s5019_s24 = smov 0   ;;  %s5021_s25 = smov 0  }
  0x23   :  { %s5023_s3 = smov 0  }
  0x24 LB: > { %6160 = sst [smem:[#allocation21_spill]] %s4843_s30  ;;  %s53_s26 = sadd.s32 1, %s4871_s24  ;;  %s4879_s3 = sphi %s5023_s3, %s44_s3   ;;  %s4875_s25 = sphi %s5021_s25, %s6269_s25   ;;  %s4871_s24 = sphi %s5019_s24, %s6268_s24   ;;  %s4867_s23 = sphi %s5017_s23, %s6267_s23   ;;  %s4863_s2 = sphi %s5015_s2, %s6266_s2   ;;  %s4859_s22 = sphi %s5013_s22, %s6265_s22   ;;  %s4855_s1 = sphi %s5011_s1, %s6264_s1   ;;  %s4851_s21 = sphi %s5009_s21, %s6263_s21   ;;  %s4847_s20 = sphi %s5007_s20, %s6262_s20   ;;  %s4843_s30 = sphi %s5005_s30, %s6261_s30   ;;  %s4839_s0 = sphi %s5003_s0, %s6260_s0  }
  0x25   : > { %6161 = sst [smem:[#allocation22_spill]] %s4847_s20  ;;  %p6099_p0 = scmp.eq.s32.totalorder %s4879_s3, 0 }
  0x26   : > { %6162 = sst [smem:[#allocation23_spill]] %s4851_s21  ;;  %p5060_p1 = scmp.ge.s32.totalorder %s53_s26, 2 }
  0x27   : > { %6163 = sst [smem:[#allocation24_spill]] %s4855_s1  ;;  %s89_s28 = sadd.s32 1, %s4847_s20 }
  0x28   : > { %6164 = sst [smem:[#allocation25_spill]] %s4859_s22  ;;  %p96_p2 = scmp.ne.s32.totalorder %s4847_s20, %s4843_s30 }
  0x29   : > { %6165 = sst [smem:[#allocation26_spill]] %s4863_s2  ;;  %s6271_s26 = smov (%p5060_p1, %s53_s26), 0 }
  0x2a   : > { %6166 = sst [smem:[#allocation27_spill]] %s4867_s23  ;;  %p98_p3 = por %p96_p2, %p6099_p0 }
  0x2b   : > { %6167 = sst [smem:[#allocation28_spill]] %s4871_s24  ;;  %s86_s29 = ssub.s32 %s4871_s24, %s6271_s26 }
  0x2c   : > { %6168 = sst [smem:[#allocation29_spill]] %s4875_s25  ;;  %p6098_p4 = scmp.lt.s32.totalorder %s4879_s3, 4 }
  0x2d   : > { %6169 = sst [smem:[#allocation30_spill]] %s4879_s3  ;;  %p87_p5 = scmp.eq.s32.totalorder %s86_s29, 0 }
  0x2e   : > { %s6170_s27 = scalar_select %p5060_p1, 1, 0 }
  0x2f   : > { %6171 = sst [smem:[#allocation31_spill]] %s6271_s26  ;;  %s5077_s19 = sand.u32 1, %s4879_s3  }
  0x30   : > { %s6097_s23 = sand.u32 1, %s4847_s20   ;;  %s5088_s16 = sshll.u32 %s4871_s24, 10 }
  0x31   : > { %s5081_s18 = scalar_select %p87_p5, %s4847_s20, %s89_s28  }
  0x32   : > { %s5085_s17 = sshll.u32 %s6097_s23, 6  ;;  %s6173_s13 = sld [smem:[#allocation43_spill]] }
  0x33   : > { %6172 = sst [smem:[#allocation32_spill]] %s5081_s18  ;;  %s615_s29 = scalar_lea.vmem [#allocation6], %s5085_s17 }
  0x34   : > { %s622_s26 = sshll.u32 %s615_s29, 4  ;;  %p5099_p6 = pnand %p6098_p4, %p98_p3  ;;  %s5103_s26 = int_to_ptr.vmem [resolvable:$true] %s622_s26 }
  0x36   : > { %s6174_s28 = scalar_select %p5099_p6, 1, 0 }
  0x37   : > { %p5110_p8 = pneg %p5099_p6 }
  0x38   : > { %s5094_s10 = scalar_lea.hbm %s6173_s13, %s5088_s16  ;;  %s4540_s12 = scalar_lea.hbm %s6173_s13, 2048 }
  0x39   : > { %s4535_s18 = scalar_lea.hbm %s5094_s10, 1024  ;;  %p4541_p11 = scmp.lt.u32.totalorder %s5094_s10, %s6173_s13 }
  0x3a   : > { %p4536_p7 = scmp.ne.s32.totalorder %s5094_s10, %s4535_s18  ;;  %p4542_p12 = scmp.lt.u32.totalorder %s4540_s12, %s4535_s18 }
  0x3b   : > { %p4544_p2 = scmp.lt.u32.totalorder %s4535_s18, %s5094_s10 }
  0x3c   : > { %p4538_p9 = pnand %p5110_p8, %p4536_p7  ;;  %p4543_p13 = por %p4542_p12, %p4541_p11 }
  0x3e   : > { %p4539_p10 = pneg %p4538_p9  ;;  %p4545_p3 = por %p4544_p2, %p4543_p13 }
  0x40   : > { %p4546_p5 = pnand %p4545_p3, %p4539_p10 }
  0x42   : > { %4549 = shalt.err (!%p4546_p5)
}
  0x43   : > { %s4550_s23 = scalar_lea.vmem %s5103_s26, 1024  ;;  %s4881_s15 = smov [#allocation6]  }
  0x44   : > { %p4551_p7 = scmp.ne.s32.totalorder %s5103_s26, %s4550_s23  ;;  %s4555_s29 = sshll.u32 %s4881_s15, 4  ;;  %s4556_s29 = int_to_ptr.vmem [resolvable:$false] %s4555_s29 }
  0x45   : > { %s4557_s6 = scalar_lea.vmem %s4556_s29, 2048  ;;  %p4558_p0 = scmp.lt.s32.totalorder %s5103_s26, %s4556_s29 }
  0x46   : > { %p4553_p9 = pnand %p4551_p7, %p5110_p8  ;;  %p4559_p1 = scmp.lt.s32.totalorder %s4557_s6, %s4550_s23 }
  0x48   : > { %p4554_p4 = pneg %p4553_p9  ;;  %p4560_p11 = por %p4559_p1, %p4558_p0 }
  0x4a   : > { %p4561_p12 = pnand %p4560_p11, %p4554_p4 }
  0x4c   : > { %4564 = shalt.err (!%p4561_p12)
}
  0x4d   : > { %s6102_s8 = smov 64   ;;  %s6104_s12 = smov 4  }
  0x4e   : > { %s6176_s18 = scalar_lea.sflag [#allocation7], %s5077_s19  ;;  %p3930_p0 = scmp.ge.s32.totalorder %s4879_s3, 1 }
  0x4f   : > { %4278 = dma.hbm_to_vmem [thread:$0]  (!%p5099_p6), %s5094_s10, 1024, %s5103_s26, %s6176_s18, %s6102_s8, %s6102_s8, %s6104_s12  }
  0x50   : > { %p796_p1 = scmp.lt.s32.totalorder %s4879_s3, 5  ;;  %s6179_s5 = sld [smem:[#allocation47_spill]] }
  0x51   : > { %s669_s13 = scalar_lea.vmem [#allocation9], %s5085_s17  ;;  %s6108_s10 = scalar_lea.sflag [#allocation10], %s5077_s19 }
  0x52   : > { %p5140_p4 = pnand %p3930_p0, %p796_p1  ;;  %s676_s4 = sshll.u32 %s669_s13, 4  ;;  %s5151_s4 = int_to_ptr.vmem [resolvable:$true] %s676_s4 }
  0x54   : > { %s6177_s23 = scalar_select %p5140_p4, 1, 0 }
  0x56   : > { %6178 = sst [smem:[#allocation33_spill]] %s6177_s23  ;;  %s5148_s6 = scalar_lea.hbm %s6179_s5, %s5088_s16 }
  0x57   : > { %s4565_s26 = scalar_lea.hbm %s5148_s6, 1024  ;;  %s4570_s15 = scalar_lea.hbm %s6179_s5, 2048 }
  0x58   : > { %p4566_p10 = scmp.ne.s32.totalorder %s5148_s6, %s4565_s26  ;;  %p4571_p3 = scmp.lt.u32.totalorder %s5148_s6, %s6179_s5 }
  0x59   : > { %p4572_p5 = scmp.lt.u32.totalorder %s4570_s15, %s4565_s26  ;;  %p4574_p9 = scmp.lt.u32.totalorder %s4565_s26, %s5148_s6 }
  0x5a   : > { %p4568_p13 = pnand %p4566_p10, %p5110_p8 }
  0x5b   : > { %p4573_p7 = por %p4572_p5, %p4571_p3 }
  0x5c   : > { %p4569_p2 = pneg %p4568_p13 }
  0x5d   : > { %p4575_p11 = por %p4574_p9, %p4573_p7 }
  0x5f   : > { %p4576_p12 = pnand %p4575_p11, %p4569_p2 }
  0x61   : > { %4579 = shalt.err (!%p4576_p12)
}
  0x62   : > { %s4580_s13 = scalar_lea.vmem %s5151_s4, 1024  ;;  %s4884_s8 = smov [#allocation9]  }
  0x63   : > { %p4581_p0 = scmp.ne.s32.totalorder %s5151_s4, %s4580_s13  ;;  %s4585_s18 = sshll.u32 %s4884_s8, 4  ;;  %s4586_s18 = int_to_ptr.vmem [resolvable:$false] %s4585_s18 }
  0x64   : > { %s4587_s12 = scalar_lea.vmem %s4586_s18, 2048  ;;  %p4588_p13 = scmp.lt.s32.totalorder %s5151_s4, %s4586_s18 }
  0x65   : > { %p4583_p1 = pnand %p4581_p0, %p5110_p8  ;;  %p4589_p4 = scmp.lt.s32.totalorder %s4587_s12, %s4580_s13 }
  0x67   : > { %p4584_p10 = pneg %p4583_p1  ;;  %p4590_p3 = por %p4589_p4, %p4588_p13 }
  0x69   : > { %p4591_p5 = pnand %p4590_p3, %p4584_p10 }
  0x6b   : > { %4594 = shalt.err (!%p4591_p5)
}
  0x6c   : > { %s6180_s26 = smov 4   ;;  %s6181_s15 = smov 64  }
  0x6d   : > { %4284 = dma.hbm_to_vmem [thread:$0]  (!%p5099_p6), %s5148_s6, 1024, %s5151_s4, %s6108_s10, %s6181_s15, %s6181_s15, %s6180_s26  }
  0x6e   : > { %s6182_s29 = sand.u32 1, %s4847_s20   ;;  %s6109_s8 = sshll.u32 %s4871_s24, 11 }
  0x6f   : > { %s5182_s13 = sshll.u32 %s6182_s29, 7  ;;  %s6183_s9 = sld [smem:[#allocation51_spill]] }
  0x70   : > { %s723_s2 = scalar_lea.vmem [#allocation12], %s5182_s13  ;;  %s6111_s4 = scalar_lea.sflag [#allocation13], %s5077_s19 }
  0x71   : > { %s730_s23 = sshll.u32 %s723_s2, 4  ;;  %s5193_s23 = int_to_ptr.vmem [resolvable:$true] %s730_s23 }
  0x75   : > { %s5190_s5 = scalar_lea.hbm %s6183_s9, %s6109_s8  ;;  %s4600_s18 = scalar_lea.hbm %s6183_s9, 4096 }
  0x76   : > { %s4595_s6 = scalar_lea.hbm %s5190_s5, 2048  ;;  %p4601_p9 = scmp.lt.u32.totalorder %s5190_s5, %s6183_s9 }
  0x77   : > { %p4596_p4 = scmp.ne.s32.totalorder %s5190_s5, %s4595_s6  ;;  %p4602_p11 = scmp.lt.u32.totalorder %s4600_s18, %s4595_s6 }
  0x78   : > { %p4604_p0 = scmp.lt.u32.totalorder %s4595_s6, %s5190_s5 }
  0x79   : > { %p4598_p2 = pnand %p4596_p4, %p5110_p8  ;;  %p4603_p12 = por %p4602_p11, %p4601_p9 }
  0x7b   : > { %p4599_p7 = pneg %p4598_p2  ;;  %p4605_p1 = por %p4604_p0, %p4603_p12 }
  0x7d   : > { %p4606_p10 = pnand %p4605_p1, %p4599_p7 }
  0x7f   : > { %4609 = shalt.err (!%p4606_p10)
}
  0x80   : > { %s4610_s2 = scalar_lea.vmem %s5193_s23, 2048  ;;  %s4885_s10 = smov [#allocation12]  }
  0x81   : > { %p4611_p13 = scmp.ne.s32.totalorder %s5193_s23, %s4610_s2  ;;  %s4615_s29 = sshll.u32 %s4885_s10, 4  ;;  %s4616_s29 = int_to_ptr.vmem [resolvable:$false] %s4615_s29 }
  0x82   : > { %s4617_s8 = scalar_lea.vmem %s4616_s29, 4096  ;;  %p4618_p4 = scmp.lt.s32.totalorder %s5193_s23, %s4616_s29 }
  0x83   : > { %p4613_p3 = pnand %p4611_p13, %p5110_p8  ;;  %p4619_p2 = scmp.lt.s32.totalorder %s4617_s8, %s4610_s2 }
  0x85   : > { %p4614_p5 = pneg %p4613_p3  ;;  %p4620_p9 = por %p4619_p2, %p4618_p4 }
  0x87   : > { %p4621_p11 = pnand %p4620_p9, %p4614_p5 }
  0x89   : > { %4624 = shalt.err (!%p4621_p11)
}
  0x8a   : > { %s6112_s6 = smov 128   ;;  %s6113_s18 = smov 8  }
  0x8b   : > { %4290 = dma.hbm_to_vmem [thread:$0]  (!%p5099_p6), %s5190_s5, 2048, %s5193_s23, %s6111_s4, %s6112_s6, %s6112_s6, %s6113_s18  }
  0x8c   : > { %p102_p7 = scmp.ne.s32.totalorder %s4843_s30, %s4839_s0  ;;  %s6184_s12 = sshll.u32 %s4871_s24, 11 }
  0x8d   : > { %s6185_s11 = sld [smem:[#allocation53_spill]]  ;;  %s751_s8 = scalar_lea.vmem [#allocation14], %s5182_s13 }
  0x8e   : > { %s5232_s9 = sshll.u32 %s751_s8, 4  ;;  %s5235_s20 = sadd.s32 4294967295, %s4879_s3   ;;  %s5377_s9 = int_to_ptr.vmem [resolvable:$true] %s5232_s9 }
  0x8f   : > { %6186 = sst [smem:[#allocation34_spill]] %s5235_s20  ;;  %s3906_s5 = sadd.s32 4294967294, %s4879_s3  }
  0x90   : > { %s56_s23 = sadd.s32 1, %s4875_s25  ;;  %p6187_p12 = scmp.ne.s32.totalorder %s6170_s27, 0 }
  0x91   : > { %s63_s4 = sadd.s32 1, %s4859_s22  ;;  %p70_p0 = scmp.ne.s32.totalorder %s4859_s22, %s4855_s1 }
  0x92   : > { %s6273_s23 = smov (!%p6187_p12, %s56_s23), %s4875_s25  ;;  %p76_p10 = scmp.ne.s32.totalorder %s4855_s1, %s4851_s21 }
  0x93   : > { %s5229_s29 = scalar_lea.hbm %s6185_s11, %s6184_s12  ;;  %p58_p1 = scmp.ge.s32.totalorder %s6273_s23, 2 }
  0x94   : > { %p6188_p13 = scmp.eq.s32.totalorder %s4879_s3, 0  ;;  %p77_p5 = scmp.eq.s32.totalorder %s5235_s20, 0 }
  0x95   : > { %s6275_s23 = smov (%p58_p1, %s6273_s23), 0  ;;  %p558_p9 = scmp.eq.s32.totalorder %s5235_s20, 3 }
  0x96   : > { %p5249_p3 = por %p6188_p13, %p70_p0  ;;  %6190 = sst [smem:[#allocation35_spill]] %s6275_s23 }
  0x97   : > { %p5259_p4 = por %p77_p5, %p76_p10  ;;  %p5266_p2 = por %p102_p7, %p77_p5 }
  0x98   : > { %s60_s2 = ssub.s32 %s4875_s25, %s6275_s23  ;;  %p564_p12 = scmp.eq.s32.totalorder %s3906_s5, 3 }
  0x99   : > { %s6191_s27 = scalar_select %p5259_p4, 1, 0 }
  0x9a   : > { %s6193_s12 = scalar_select %p5266_p2, 1, 0 }
  0x9b   : > { %6192 = sst [smem:[#allocation36_spill]] %s6191_s27  ;;  %p61_p11 = scmp.eq.s32.totalorder %s60_s2, 0 }
  0x9c   : > { %6194 = sst [smem:[#allocation37_spill]] %s6193_s12  ;;  %p5273_p1 = por %p558_p9, %p70_p0 }
  0x9d   : > { %s590_s8 = sand.u32 1, %s4859_s22   ;;  %p5284_p13 = por %p564_p12, %p76_p10 }
  0x9e   : > { %s6195_s10 = scalar_select %p5273_p1, 1, 0 }
  0x9f   : > { %s5279_s6 = scalar_select %p61_p11, %s4859_s22, %s63_s4  }
  0xa0   : > { %6196 = sst [smem:[#allocation38_spill]] %s6195_s10  ;;  %s3909_s0 = sshll.u32 %s590_s8, 4 }
  0xa1   : > { %6197 = sst [smem:[#allocation39_spill]] %s5279_s6  ;;  %s4046_s24 = sshll.u32 %s4875_s25, 8 }
  0xa2   : > { %s6198_s18 = scalar_select %p5284_p13, 1, 0 }
  0xa3   : > { %s6200_s23 = sld [smem:[#allocation42_spill]]  ;;  %s594_s5 = scalar_lea.vmem [#allocation3], %s3909_s0 }
  0xa4   : > { %6199 = sst [smem:[#allocation40_spill]] %s6198_s18  ;;  %s601_s2 = sshll.u32 %s594_s5, 4  ;;  %s5302_s2 = int_to_ptr.vmem [resolvable:$true] %s601_s2 }
  0xa5   : > { %p6202_p7 = scmp.lt.s32.totalorder %s4879_s3, 4  ;;  %s5310_s6 = scalar_lea.sflag [#allocation4], %s590_s8 }
  0xa7   : > { %p5298_p0 = pnand %p6202_p7, %p5249_p3 }
  0xa9   : > { %s6201_s27 = smov %s6200_s23  ;;  %s5292_s20 = scalar_lea.hbm %s6200_s23, %s4046_s24 }
  0xaa   : > { %s6204_s24 = sld [smem:[#allocation45_spill]]  ;;  %s4625_s22 = scalar_lea.hbm %s5292_s20, 256 }
  0xab   : > { %p4626_p10 = scmp.ne.s32.totalorder %s5292_s20, %s4625_s22  ;;  %p4627_p5 = pneg %p5298_p0 }
  0xac   : > { %s4630_s5 = scalar_lea.hbm %s6201_s27, 512  ;;  %p4631_p11 = scmp.lt.u32.totalorder %s5292_s20, %s6201_s27 }
  0xad   : > { %p4628_p3 = pnand %p4627_p5, %p4626_p10  ;;  %p4632_p12 = scmp.lt.u32.totalorder %s4630_s5, %s4625_s22 }
  0xae   : > { %p4634_p13 = scmp.lt.u32.totalorder %s4625_s22, %s5292_s20 }
  0xaf   : > { %p4629_p9 = pneg %p4628_p3  ;;  %p4633_p7 = por %p4632_p12, %p4631_p11 }
  0xb0   : > { %s6205_s12 = smov %s6204_s24  ;;  %s5308_s23 = scalar_lea.hbm %s6204_s24, %s5088_s16 }
  0xb1   : > { %p4635_p1 = por %p4634_p13, %p4633_p7 }
  0xb3   : > { %p4636_p2 = pnand %p4635_p1, %p4629_p9 }
  0xb5   : > { %4639 = shalt.err (!%p4636_p2)
}
  0xb6   : > { %s4640_s25 = scalar_lea.vmem %s5302_s2, 256  ;;  %s4888_s8 = smov [#allocation3]  }
  0xb7   : > { %p4641_p10 = scmp.ne.s32.totalorder %s5302_s2, %s4640_s25  ;;  %s4645_s30 = sshll.u32 %s4888_s8, 4  ;;  %s4646_s30 = int_to_ptr.vmem [resolvable:$false] %s4645_s30 }
  0xb8   : > { %s4647_s21 = scalar_lea.vmem %s4646_s30, 512  ;;  %p4648_p6 = scmp.lt.s32.totalorder %s5302_s2, %s4646_s30 }
  0xb9   : > { %p4643_p3 = pnand %p4641_p10, %p4627_p5  ;;  %p4649_p11 = scmp.lt.s32.totalorder %s4647_s21, %s4640_s25 }
  0xbb   : > { %p4644_p4 = pneg %p4643_p3  ;;  %p4650_p12 = por %p4649_p11, %p4648_p6 }
  0xbd   : > { %p4651_p13 = pnand %p4650_p12, %p4644_p4 }
  0xbf   : > { %4654 = shalt.err (!%p4651_p13)
}
  0xc0   : > { %s6206_s22 = smov 8   ;;  %s6207_s18 = smov 128  }
  0xc1   : > { %4275 = dma.hbm_to_vmem [thread:$0]  (!%p5298_p0), %s5292_s20, 256, %s5302_s2, %s5310_s6, %s6207_s18, %s6207_s18, %s6206_s22  }
  0xc2   : > { %s642_s24 = scalar_lea.vmem [#allocation8], %s5085_s17  ;;  %s6208_s7 = sld [smem:[#allocation49_spill]] }
  0xc3   : > { %s649_s13 = sshll.u32 %s642_s24, 4  ;;  %s4655_s25 = scalar_lea.hbm %s5308_s23, 1024  ;;  %s5342_s13 = int_to_ptr.vmem [resolvable:$true] %s649_s13 }
  0xc4   : > { %p4656_p6 = scmp.ne.s32.totalorder %s5308_s23, %s4655_s25  ;;  %s4660_s21 = scalar_lea.hbm %s6205_s12, 2048 }
  0xc5   : > { %p4661_p1 = scmp.lt.u32.totalorder %s5308_s23, %s6205_s12  ;;  %p4662_p0 = scmp.lt.u32.totalorder %s4660_s21, %s4655_s25 }
  0xc6   : > { %p4658_p4 = pnand %p4656_p6, %p5110_p8  ;;  %p4664_p9 = scmp.lt.u32.totalorder %s4655_s25, %s5308_s23 }
  0xc7   : > { %p4663_p5 = por %p4662_p0, %p4661_p1 }
  0xc8   : > { %s5348_s5 = scalar_lea.hbm %s6208_s7, %s5088_s16  ;;  %p4659_p2 = pneg %p4658_p4 }
  0xc9   : > { %p4665_p7 = por %p4664_p9, %p4663_p5 }
  0xcb   : > { %p4666_p10 = pnand %p4665_p7, %p4659_p2 }
  0xcd   : > { %4669 = shalt.err (!%p4666_p10)
}
  0xce   : > { %s4670_s16 = scalar_lea.vmem %s5342_s13, 1024  ;;  %s4889_s6 = smov [#allocation8]  }
  0xcf   : > { %p4671_p3 = scmp.ne.s32.totalorder %s5342_s13, %s4670_s16  ;;  %s4675_s2 = sshll.u32 %s4889_s6, 4  ;;  %s4676_s2 = int_to_ptr.vmem [resolvable:$false] %s4675_s2 }
  0xd0   : > { %s4677_s27 = scalar_lea.vmem %s4676_s2, 2048  ;;  %p4678_p13 = scmp.lt.s32.totalorder %s5342_s13, %s4676_s2 }
  0xd1   : > { %p4673_p11 = pnand %p4671_p3, %p5110_p8  ;;  %p4679_p6 = scmp.lt.s32.totalorder %s4677_s27, %s4670_s16 }
  0xd3   : > { %p4674_p12 = pneg %p4673_p11  ;;  %p4680_p4 = por %p4679_p6, %p4678_p13 }
  0xd5   : > { %p4681_p1 = pnand %p4680_p4, %p4674_p12 }
  0xd7   : > { %4684 = shalt.err (!%p4681_p1)
}
  0xd8   : > { %p6209_p2 = scmp.ne.s32.totalorder %s6174_s28, 0  ;;  %s6210_s22 = scalar_lea.sflag [#allocation7], %s5077_s19 }
  0xd9   : > { %s696_s18 = scalar_lea.vmem [#allocation11], %s5085_s17  ;;  %s4685_s0 = scalar_lea.hbm %s5348_s5, 1024 }
  0xda   : > { %4281 = dma.hbm_to_vmem [thread:$0]  (!%p6209_p2), %s5308_s23, 1024, %s5342_s13, %s6210_s22, %s6181_s15, %s6181_s15, %s6180_s26  }
  0xdb   : > { %s703_s24 = sshll.u32 %s696_s18, 4  ;;  %p4686_p0 = scmp.ne.s32.totalorder %s5348_s5, %s4685_s0  ;;  %s5380_s24 = int_to_ptr.vmem [resolvable:$true] %s703_s24 }
  0xdc   : > { %s4690_s8 = scalar_lea.hbm %s6208_s7, 2048  ;;  %p4691_p7 = scmp.lt.u32.totalorder %s5348_s5, %s6208_s7 }
  0xdd   : > { %p4688_p5 = pnand %p4686_p0, %p5110_p8  ;;  %p4692_p10 = scmp.lt.u32.totalorder %s4690_s8, %s4685_s0 }
  0xde   : > { %p4694_p11 = scmp.lt.u32.totalorder %s4685_s0, %s5348_s5 }
  0xdf   : > { %p4689_p9 = pneg %p4688_p5  ;;  %p4693_p3 = por %p4692_p10, %p4691_p7 }
  0xe1   : > { %p4695_p12 = por %p4694_p11, %p4693_p3 }
  0xe3   : > { %p4696_p13 = pnand %p4695_p12, %p4689_p9 }
  0xe5   : > { %4699 = shalt.err (!%p4696_p13)
}
  0xe6   : > { %s4700_s17 = scalar_lea.vmem %s5380_s24, 1024  ;;  %s4890_s23 = smov [#allocation11]  }
  0xe7   : > { %p4701_p6 = scmp.ne.s32.totalorder %s5380_s24, %s4700_s17  ;;  %s4705_s13 = sshll.u32 %s4890_s23, 4  ;;  %s4706_s13 = int_to_ptr.vmem [resolvable:$false] %s4705_s13 }
  0xe8   : > { %s4707_s20 = scalar_lea.vmem %s4706_s13, 2048  ;;  %p4708_p0 = scmp.lt.s32.totalorder %s5380_s24, %s4706_s13 }
  0xe9   : > { %p4703_p4 = pnand %p4701_p6, %p5110_p8  ;;  %p4709_p5 = scmp.lt.s32.totalorder %s4707_s20, %s4700_s17 }
  0xeb   : > { %p4704_p1 = pneg %p4703_p4  ;;  %p4710_p7 = por %p4709_p5, %p4708_p0 }
  0xed   : > { %p4711_p10 = pnand %p4710_p7, %p4704_p1 }
  0xef   : > { %4714 = shalt.err (!%p4711_p10)
}
  0xf0   : > { %s6211_s16 = scalar_lea.sflag [#allocation10], %s5077_s19  ;;  %s4715_s6 = scalar_lea.hbm %s5229_s29, 2048 }
  0xf1   : > { %4287 = dma.hbm_to_vmem [thread:$0]  (!%p6209_p2), %s5348_s5, 1024, %s5380_s24, %s6211_s16, %s6181_s15, %s6181_s15, %s6180_s26  }
  0xf2   : > { %p4716_p9 = scmp.ne.s32.totalorder %s5229_s29, %s4715_s6  ;;  %s4720_s22 = scalar_lea.hbm %s6185_s11, 4096 }
  0xf3   : > { %p4721_p12 = scmp.lt.u32.totalorder %s5229_s29, %s6185_s11  ;;  %p4722_p13 = scmp.lt.u32.totalorder %s4720_s22, %s4715_s6 }
  0xf4   : > { %p4718_p3 = pnand %p4716_p9, %p5110_p8  ;;  %p4724_p4 = scmp.lt.u32.totalorder %s4715_s6, %s5229_s29 }
  0xf5   : > { %p4723_p6 = por %p4722_p13, %p4721_p12 }
  0xf6   : > { %p4719_p11 = pneg %p4718_p3 }
  0xf7   : > { %p4725_p1 = por %p4724_p4, %p4723_p6 }
  0xf9   : > { %p4726_p0 = pnand %p4725_p1, %p4719_p11 }
  0xfb   : > { %4729 = shalt.err (!%p4726_p0)
}
  0xfc   : > { %s4730_s5 = scalar_lea.vmem %s5377_s9, 2048  ;;  %s4891_s24 = smov [#allocation14]  }
  0xfd   : > { %p4731_p5 = scmp.ne.s32.totalorder %s5377_s9, %s4730_s5  ;;  %s4735_s4 = sshll.u32 %s4891_s24, 4  ;;  %s4736_s4 = int_to_ptr.vmem [resolvable:$false] %s4735_s4 }
  0xfe   : > { %s4737_s25 = scalar_lea.vmem %s4736_s4, 4096  ;;  %p4738_p9 = scmp.lt.s32.totalorder %s5377_s9, %s4736_s4 }
  0xff   : > { %p4733_p7 = pnand %p4731_p5, %p5110_p8  ;;  %p4739_p3 = scmp.lt.s32.totalorder %s4737_s25, %s4730_s5 }
 0x101   : > { %p4734_p10 = pneg %p4733_p7  ;;  %p4740_p12 = por %p4739_p3, %p4738_p9 }
 0x103   : > { %p4741_p13 = pnand %p4740_p12, %p4734_p10 }
 0x105   : > { %4744 = shalt.err (!%p4741_p13)
}
 0x106   : > { %s6212_s8 = scalar_lea.sflag [#allocation13], %s5077_s19  ;;  %s6213_s14 = sld [smem:[#allocation33_spill]] }
 0x107   : > { %4293 = dma.hbm_to_vmem [thread:$0]  (!%p6209_p2), %s5229_s29, 2048, %s5377_s9, %s6212_s8, %s6181_s15, %s6181_s15, %s6180_s26  }
 0x10c   : > { %p6214_p8 = scmp.ne.s32.totalorder %s6213_s14, 0 }
 0x10e   : > { %800 = sbr.rel (%p6214_p8) target bundleno = 3316 (0xcf4), region = 96 }
 0x115   : > { %s6215_s30 = sld [smem:[#allocation36_spill]]  ;;  %s5437_s21 = sand.u32 1, %s4855_s1  }
 0x116   : > { %s6132_s17 = sshll.u32 %s5437_s21, 4  ;;  %s803_s28 = scalar_lea.sflag [#allocation4], %s5437_s21 }
 0x117   : > { %s5443_s23 = scalar_lea.vmem [#allocation3], %s6132_s17 }
 0x11b   : > { %p6216_p11 = scmp.ne.s32.totalorder %s6215_s30, 0 }
 0x11d   : > { %4818 = dma.done.wait (%p6216_p11), %s803_s28, 256  }
 0x11e   : > { %4820 = vsyncadd (%p6216_p11), %s803_s28, 4294967040  ;;  %s6217_s9 = sld [smem:[#allocation34_spill]]  ;;  %s6218_s19 = sld [smem:[#allocation21_spill]] }
 0x11f   : > { %s6219_s26 = sld [smem:[#allocation37_spill]] }
 0x124   : > { %s811_s15 = sand.u32 1, %s6217_s9   ;;  %s813_s29 = sand.u32 1, %s6218_s19  }
 0x125   : > { %s3932_s13 = sshll.u32 %s813_s29, 6  ;;  %s812_s20 = scalar_lea.sflag [#allocation7], %s811_s15 }
 0x126   : > { %s5451_s16 = scalar_lea.vmem [#allocation6], %s3932_s13  ;;  %p6220_p2 = scmp.ne.s32.totalorder %s6219_s26, 0 }
 0x128   : > { %4822 = dma.done.wait (%p6220_p2), %s812_s20, 2048  }
 0x129   : > { %4824 = vsyncadd (%p6220_p2), %s812_s20, 4294965248  ;;  %s5457_s6 = scalar_lea.vmem [#allocation8], %s3932_s13  ;;  %s830_s2 = scalar_lea.sflag [#allocation10], %s811_s15 }
 0x12a   : > { %s5459_s27 = scalar_lea.vmem [#allocation9], %s3932_s13 }
 0x12b   : > { %4826 = dma.done.wait (%p6220_p2), %s830_s2, 2048  }
 0x12c   : > { %4828 = vsyncadd (%p6220_p2), %s830_s2, 4294965248  ;;  %s3936_s22 = sshll.u32 %s813_s29, 7  ;;  %s5465_s18 = scalar_lea.vmem [#allocation11], %s3932_s13 }
 0x12d   : > { %s848_s0 = scalar_lea.sflag [#allocation13], %s811_s15  ;;  %s5467_s5 = scalar_lea.vmem [#allocation12], %s3936_s22 }
 0x12e   : > { %6221 = sst [smem:[#allocation41_spill]] %s5467_s5 }
 0x12f   : > { %4830 = dma.done.wait (%p6220_p2), %s848_s0, 4096  }
 0x130   : > { %4832 = vsyncadd (%p6220_p2), %s848_s0, 4294963200  ;;  %s6222_s24 = sld [smem:[#allocation26_spill]]  ;;  %s6228_s14 = sld [smem:[#allocation52_spill]] }
 0x131   : > { %s6229_s19 = sld [smem:[#allocation55_spill]]  ;;  %s6230_s13 = sld [smem:[#allocation56_spill]] }
 0x132   : > { %s6231_s25 = sld [smem:[#allocation57_spill]]  ;;  %s6232_s11 = sld [smem:[#allocation58_spill]] }
 0x133   : > { %s5519_s1 = scalar_lea.vmem [#allocation14], %s3936_s22  ;;  %s6233_s3 = sshll.u32 %s5437_s21, 4 }
 0x134   : > { %s5523_s10 = scalar_lea.vmem [#allocation15], %s6233_s3 }
 0x136   : > { %p976_p6 = scmp.lt.s32.totalorder %s6222_s24, 1  ;;  %p3940_p4 = scmp.ne.s32.totalorder %s6222_s24, 0 }
 0x137   : > { %v1012_v0 = vld [vmem:[%s5443_s23] sm:$0xff] (!%p3940_p4)  ;;  %v1013_v1 = vld [vmem:[%s5443_s23 + $0x8] sm:$0xff] (!%p3940_p4) }
 0x138   : > { %s5475_s4 = scalar_select %p976_p6, %s6222_s24, 1 }
 0x139   : > { %1011 = sbr.rel (%p3940_p4) target bundleno = 320 (0x140), region = 128  ;;  %1014 = vst [vmem:[#allocation2] sm:$0xff] (!%p3940_p4), %v1012_v0  ;;  %1015 = vst [vmem:[#allocation2 + $0x8] sm:$0xff] (!%p3940_p4), %v1013_v1 }
 0x13a   : > { %s3939_s17 = sshll.u32 %s5475_s4, 1  ;;  %s997_s26 = scalar_lea.vmem %s6229_s19, %s5475_s4 }
 0x13b   : > { %s5501_s30 = scalar_lea.vmem %s6228_s14, %s3939_s17  ;;  %s1000_s20 = scalar_lea.vmem %s6230_s13, %s5475_s4 }
 0x13c   : > { %s1003_s8 = scalar_lea.vmem %s6231_s25, %s5475_s4  ;;  %s1006_s12 = scalar_lea.vmem %s6232_s11, %s5475_s4 }
 0x140 PF: > { %v4417_v2 = vld [vmem:[%s5457_s6] sm:$0xff]   ;;  %v4892_v3 = vmov 0.0   ;;  %v4418_v4 = vld [vmem:[%s5457_s6 + $0x8] sm:$0xff]   ;;  %vm4893_vm0 = vmmov 0   ;;  %v4420_v7 = vld [vmem:[%s5457_s6 + $0x10] sm:$0xff]   ;;  %s4894_s22 = smov 64   ;;  %v1380_v46 = vlaneseq }
 0x141   : > { %4148 = vmatprep.subr.bf16.mxu1 %v4892_v3  ;;  %4128 = vmatprep.subr.bf16.mxu0 %v4892_v3  ;;  %v4419_v5 = vld [vmem:[%s5451_s16] sm:$0xff]   ;;  %v4421_v6 = vld [vmem:[%s5451_s16 + $0x8] sm:$0xff]   ;;  %v4423_v8 = vld [vmem:[%s5451_s16 + $0x10] sm:$0xff]   ;;  %s6236_s14 = sld [smem:[#allocation44_spill]]  ;;  %s4896_s9 = smov 32   ;;  %vm2243_vm1 = vcmask 261120  }
 0x142   : > { %4149 = vmatpush3.bf16.msra.mxu1 %v4417_v2  ;;  %4164 = vmatprep.mubr.msk.bf16.mxu1 %vm4893_vm0, %v4892_v3  ;;  %v4422_v9 = vld [vmem:[%s5457_s6 + $0x18] sm:$0xff]   ;;  %v4424_v11 = vld [vmem:[%s5457_s6 + $0x20] sm:$0xff]   ;;  %v4426_v12 = vld [vmem:[%s5457_s6 + $0x28] sm:$0xff]   ;;  %v4897_v44 = vmov 1983009808   ;;  %v5620_v50 = vshrl.u32 %v1380_v46, 7 }
 0x143   : > { %4150 = vmatprep.subr.bf16.mxu1 %v4892_v3  ;;  %4144 = vmatprep.mubr.msk.bf16.mxu0 %vm4893_vm0, %v4892_v3  ;;  %v4425_v10 = vld [vmem:[%s5451_s16 + $0x18] sm:$0xff]   ;;  %v4427_v13 = vld [vmem:[%s5451_s16 + $0x20] sm:$0xff]   ;;  %v4429_v14 = vld [vmem:[%s5451_s16 + $0x28] sm:$0xff]   ;;  %v1378_v45 = vunpack.c.l.s4 %v4897_v44  ;;  %v4898_v47 = vmov 1934713408   ;;  %s6238_s29 = sld [smem:[#allocation48_spill]] }
 0x144   : > { %4129 = vmatpush3.bf16.msra.mxu0 %v4419_v5  ;;  %v4428_v15 = vld [vmem:[%s5457_s6 + $0x30] sm:$0xff]   ;;  %v4430_v17 = vld [vmem:[%s5457_s6 + $0x38] sm:$0xff]   ;;  %v4433_v22 = vld [vmem:[%s5459_s27] sm:$0xff]   ;;  %v1410_v48 = vunpack.c.l.s4 %v4898_v47  ;;  %vm2432_vm2 = vcmask 130048   ;;  %vm2999_vm3 = vcmask 523264   ;;  %vm3002_vm4 = vcmask 785408  }
 0x145   : > { %4130 = vmatprep.subr.bf16.mxu0 %v4892_v3  ;;  %v4431_v16 = vld [vmem:[%s5451_s16 + $0x30] sm:$0xff]   ;;  %v1017_v19 = vld [vmem:[#allocation2 + $0x8] sm:$0xff]  ;;  %v4434_v23 = vld [vmem:[%s5459_s27 + $0x8] sm:$0xff]   ;;  %v1379_v49 = vunpack.c.0.s8 %v1378_v45  ;;  %s6241_s25 = sld [smem:[#allocation50_spill]] }
 0x146   : > { %4151 = vmatpush3.bf16.msra.mxu1 %v4418_v4  ;;  %v1016_v18 = vld [vmem:[#allocation2] sm:$0xff]  ;;  %v4432_v20 = vld [vmem:[%s5451_s16 + $0x38] sm:$0xff]   ;;  %v4437_v26 = vld [vmem:[%s5459_s27 + $0x20] sm:$0xff]   ;;  %s6234_s16 = sld [smem:[#allocation46_spill]]  ;;  %v1411_v53 = vunpack.c.0.s8 %v1410_v48 }
 0x147   : > { %4152 = vmatprep.subr.bf16.mxu1 %v4892_v3  ;;  %v1018_v21 = vpack.c.bf16 %v1017_v19, %v1016_v18  ;;  %v4435_v24 = vld [vmem:[%s5459_s27 + $0x10] sm:$0xff]   ;;  %v4436_v25 = vld [vmem:[%s5459_s27 + $0x18] sm:$0xff]   ;;  %v4438_v27 = vld [vmem:[%s5459_s27 + $0x28] sm:$0xff]   ;;  %s6237_s28 = scalar_lea.vmem %s6236_s14, %s5475_s4  ;;  %v5623_v54 = vsub.s32 %v1379_v49, %v5620_v50 }
 0x148   : > { %4131 = vmatpush3.bf16.msra.mxu0 %v4421_v6  ;;  %v4439_v28 = vld [vmem:[%s5459_s27 + $0x30] sm:$0xff]   ;;  %v4440_v29 = vld [vmem:[%s5459_s27 + $0x38] sm:$0xff]   ;;  %s4895_s27 = smov 96   ;;  %v5626_v61 = vsub.s32 %v1411_v53, %v5620_v50 }
 0x149   : > { %4132 = vmatprep.subr.bf16.mxu0 %v4892_v3  ;;  %v3941_v38 = vld [vmem:[%s6237_s28] ss:$0 sm:$0xff]  ;;  %s6239_s13 = scalar_lea.vmem %s6238_s29, %s5475_s4 }
 0x14a   : > { %4153 = vmatpush3.bf16.msra.mxu1 %v4420_v7 }
 0x14b   : > { %4154 = vmatprep.subr.bf16.mxu1 %v4892_v3  ;;  %s6242_s7 = scalar_lea.vmem %s6241_s25, %s5475_s4 }
 0x14c   : > { %4133 = vmatpush3.bf16.msra.mxu0 %v4423_v8  ;;  %s6235_s6 = scalar_lea.vmem %s6234_s16, %s5475_s4 }
 0x14d   : > { %4134 = vmatprep.subr.bf16.mxu0 %v4892_v3  ;;  %v3950_v30 = vld [vmem:[%s6235_s6] ss:$0 sm:$0xff] }
 0x14e   : > { %4155 = vmatpush3.bf16.msra.mxu1 %v4422_v9 }
 0x14f   : > { %4156 = vmatprep.subr.bf16.mxu1 %v4892_v3 }
 0x150   : > { %4135 = vmatpush3.bf16.msra.mxu0 %v4425_v10 }
 0x151   : > { %4136 = vmatprep.subr.bf16.mxu0 %v4892_v3 }
 0x152   : > { %4157 = vmatpush3.bf16.msra.mxu1 %v4424_v11 }
 0x153   : > { %4158 = vmatprep.subr.bf16.mxu1 %v4892_v3 }
 0x154   : > { %4137 = vmatpush3.bf16.msra.mxu0 %v4427_v13 }
 0x155   : > { %4138 = vmatprep.subr.bf16.mxu0 %v4892_v3 }
 0x156   : > { %4159 = vmatpush3.bf16.msra.mxu1 %v4426_v12 }
 0x157   : > { %4160 = vmatprep.subr.bf16.mxu1 %v4892_v3 }
 0x158   : > { %4139 = vmatpush3.bf16.msra.mxu0 %v4429_v14 }
 0x159   : > { %4140 = vmatprep.subr.bf16.mxu0 %v4892_v3 }
 0x15a   : > { %4161 = vmatpush3.bf16.msra.mxu1 %v4428_v15 }
 0x15b   : > { %4162 = vmatprep.subr.bf16.mxu1 %v4892_v3 }
 0x15c   : > { %4141 = vmatpush3.bf16.msra.mxu0 %v4431_v16 }
 0x15d   : > { %4142 = vmatprep.subr.bf16.mxu0 %v4892_v3 }
 0x15e   : > { %4163 = vmatpush3.bf16.msra.mxu1 %v4430_v17 }
 0x15f   : > { %4188 = vmatprep.subr.bf16.mxu1 %v4892_v3 }
 0x160   : > { %4143 = vmatpush3.bf16.msra.mxu0 %v4432_v20 }
 0x161   : > { %4165 = vmatmul.mubr.bf16.vlgmr.msra.gmra.mrb[0].mxu1 %v1018_v21  ;;  %4168 = vmatprep.subr.bf16.mxu0 %v4892_v3 }
 0x162   : > { %4190 = vmatprep.mubr.msk.bf16.mxu1 %vm4893_vm0, %v4892_v3 }
 0x163   : > { %4145 = vmatmul.mubr.bf16.vlgmr.msra.gmra.mrb[0].mxu0 %v1018_v21 }
 0x164   : > { %4184 = vmatprep.mubr.msk.bf16.mxu0 %vm4893_vm0, %v4892_v3  ;;  %4169 = vmatpush3.bf16.msra.mxu0 %v4433_v22 }
 0x165   : > { %4170 = vmatprep.subr.bf16.mxu0 %v4892_v3 }
 0x168   : > { %4171 = vmatpush3.bf16.msra.mxu0 %v4434_v23 }
 0x169   : > { %4172 = vmatprep.subr.bf16.mxu0 %v4892_v3 }
 0x16c   : > { %4173 = vmatpush3.bf16.msra.mxu0 %v4435_v24 }
 0x16d   : > { %4174 = vmatprep.subr.bf16.mxu0 %v4892_v3 }
 0x170   : > { %4175 = vmatpush3.bf16.msra.mxu0 %v4436_v25 }
 0x171   : > { %4176 = vmatprep.subr.bf16.mxu0 %v4892_v3 }
 0x174   : > { %4177 = vmatpush3.bf16.msra.mxu0 %v4437_v26 }
 0x175   : > { %4178 = vmatprep.subr.bf16.mxu0 %v4892_v3 }
 0x178   : > { %4179 = vmatpush3.bf16.msra.mxu0 %v4438_v27 }
 0x179   : > { %4180 = vmatprep.subr.bf16.mxu0 %v4892_v3 }
 0x17c   : > { %4181 = vmatpush3.bf16.msra.mxu0 %v4439_v28 }
 0x17d   : > { %4182 = vmatprep.subr.bf16.mxu0 %v4892_v3 }
 0x180   : > { %4183 = vmatpush3.bf16.msra.mxu0 %v4440_v29 }
 0x181   : > { %4236 = vmatprep.subr.bf16.mxu0 %v4892_v3 }
 0x183   : > { %4185 = vmatmul.mubr.bf16.vlgmr.msra.gmra.mrb[4].mxu0 %v1018_v21 }
 0x184   : > { %4252 = vmatprep.mubr.msk.bf16.mxu0 %vm4893_vm0, %v4892_v3 }
 0x234   : > { %v1236_v31 = vpop.f32.mrb[0].mxu1 }
 0x235   : > { %v1237_v32 = vadd.f32 %v3950_v30, %v1236_v31  ;;  %v4166_v33 = vpop.f32.mrb[1].mxu1 }
 0x236   : > { %v1239_v34 = vpop.f32.mrb[2].mxu1  ;;  %v1124_v35 = vpop.f32.mrb[0].mxu0 }
 0x237   : > { %1659 = vrot.lane.b32.xlu1 %v1237_v32, %s4894_s22  ;;  %1653 = vrot.lane.b32.xlu0 %v1237_v32, %s4895_s27  ;;  %v4167_v36 = vpop.f32.mrb[3].mxu1  ;;  %v4146_v37 = vpop.f32.mrb[1].mxu0  ;;  %v1240_v40 = vadd.f32 %v3950_v30, %v1239_v34  ;;  %v5600_v42 = vadd.f32 %v3941_v38, %v1124_v35 }
 0x238   : > { %v1127_v39 = vpop.f32.mrb[2].mxu0 }
 0x239   : > { %v4147_v41 = vpop.f32.mrb[3].mxu0  ;;  %v5607_v43 = vadd.f32 %v3941_v38, %v1127_v39 }
 0x23b   : > { %1665 = vrot.lane.b32.xlu0 %v1237_v32, %s4896_s9  ;;  %1661 = vrot.lane.b32.xlu1 %v1240_v40, %s4894_s22 }
 0x23f   : > { %1667 = vrot.lane.b32.xlu1 %v1240_v40, %s4896_s9  ;;  %1357 = vrot.lane.b32.xlu0 %v5600_v42, %s4895_s27 }
 0x243   : > { %1655 = vrot.lane.b32.xlu0 %v1240_v40, %s4895_s27  ;;  %1359 = vrot.lane.b32.xlu1 %v5607_v43, %s4895_s27 }
 0x247   : > { %1363 = vrot.lane.b32.xlu0 %v5600_v42, %s4894_s22  ;;  %1365 = vrot.lane.b32.xlu1 %v5607_v43, %s4894_s22 }
 0x24b   : > { %1369 = vrot.lane.b32.xlu0 %v5600_v42, %s4896_s9  ;;  %1371 = vrot.lane.b32.xlu1 %v5607_v43, %s4896_s9 }
 0x2a9   : > { %v1660_v51 = vpop.permute.xlu1 %1659  ;;  %v1654_v52 = vpop.permute.xlu0 %1653 }
 0x2aa   : > { %v1671_v55 = vcombine.low %v1237_v32, %v1660_v51  ;;  %v1672_v56 = vcombine.high %v1237_v32, %v1660_v51 }
 0x2ac   : > { %v1679_v62 = vrot.slane %v1671_v55, %v5623_v54  ;;  %v1686_v63 = vrot.slane %v1672_v56, %v5623_v54 }
 0x2ad   : > { %v1666_v57 = vpop.permute.xlu0 %1665  ;;  %v1662_v58 = vpop.permute.xlu1 %1661 }
 0x2ae   : > { %v1687_v59 = vcombine.low %v1654_v52, %v1666_v57  ;;  %v1688_v60 = vcombine.high %v1654_v52, %v1666_v57  ;;  %v1739_v13 = vcombine.low %v1240_v40, %v1662_v58  ;;  %v1740_v14 = vcombine.high %v1240_v40, %v1662_v58 }
 0x2b0   : > { %v1695_v0 = vrot.slane %v1687_v59, %v5623_v54  ;;  %v1702_v1 = vrot.slane %v1688_v60, %v5623_v54  ;;  %v1747_v23 = vrot.slane %v1739_v13, %v5623_v54  ;;  %v1754_v24 = vrot.slane %v1740_v14, %v5623_v54 }
 0x2b1   : > { %v1668_v2 = vpop.permute.xlu1 %1667  ;;  %v1358_v4 = vpop.permute.xlu0 %1357 }
 0x2b2   : > { %v1703_v5 = vcombine.low %v1679_v62, %v1695_v0  ;;  %v1704_v6 = vcombine.high %v1679_v62, %v1695_v0  ;;  %v1719_v7 = vcombine.low %v1686_v63, %v1702_v1  ;;  %v1720_v8 = vcombine.high %v1686_v63, %v1702_v1 }
 0x2b4   : > { %v1711_v9 = vrot.slane %v1703_v5, %v5626_v61  ;;  %v1718_v10 = vrot.slane %v1704_v6, %v5626_v61  ;;  %v1727_v11 = vrot.slane %v1719_v7, %v5626_v61  ;;  %v1734_v12 = vrot.slane %v1720_v8, %v5626_v61 }
 0x2b5   : > { %v1656_v15 = vpop.permute.xlu0 %1655  ;;  %v1360_v16 = vpop.permute.xlu1 %1359 }
 0x2b6   : > { %v1755_v17 = vcombine.low %v1656_v15, %v1668_v2  ;;  %v1756_v18 = vcombine.high %v1656_v15, %v1668_v2  ;;  %v1807_v19 = vcombine.low %v1711_v9, %v1718_v10  ;;  %v3972_v20 = vcombine.high %v1711_v9, %v1718_v10 }
 0x2b7   : > { %v1823_v21 = vcombine.low %v1727_v11, %v1734_v12  ;;  %v3973_v22 = vcombine.high %v1727_v11, %v1734_v12 }
 0x2b8   : > { %v1763_v25 = vrot.slane %v1755_v17, %v5623_v54  ;;  %v1770_v26 = vrot.slane %v1756_v18, %v5623_v54  ;;  %v5645_v37 = vrot.slane %v1807_v19, %v5623_v54  ;;  %v5648_v38 = vrot.slane %v3972_v20, %v5623_v54 }
 0x2b9   : > { %v1364_v27 = vpop.permute.xlu0 %1363  ;;  %v1366_v28 = vpop.permute.xlu1 %1365  ;;  %v5651_v39 = vrot.slane %v1823_v21, %v5623_v54  ;;  %v5654_v40 = vrot.slane %v3973_v22, %v5623_v54 }
 0x2ba   : > { %v1375_v29 = vcombine.low %v5600_v42, %v1364_v27  ;;  %v1376_v30 = vcombine.high %v5600_v42, %v1364_v27  ;;  %v1443_v31 = vcombine.low %v5607_v43, %v1366_v28  ;;  %v1444_v32 = vcombine.high %v5607_v43, %v1366_v28 }
 0x2bb   : > { %v1771_v33 = vcombine.low %v1747_v23, %v1763_v25  ;;  %v1772_v34 = vcombine.high %v1747_v23, %v1763_v25  ;;  %v1787_v35 = vcombine.low %v1754_v24, %v1770_v26  ;;  %v1788_v36 = vcombine.high %v1754_v24, %v1770_v26 }
 0x2bc   : > { %v1383_v52 = vrot.slane %v1375_v29, %v5623_v54  ;;  %v1390_v53 = vrot.slane %v1376_v30, %v5623_v54  ;;  %v1451_v55 = vrot.slane %v1443_v31, %v5623_v54  ;;  %v1458_v56 = vrot.slane %v1444_v32, %v5623_v54 }
 0x2bd   : > { %v1779_v41 = vrot.slane %v1771_v33, %v5626_v61  ;;  %v1786_v42 = vrot.slane %v1772_v34, %v5626_v61  ;;  %v1795_v43 = vrot.slane %v1787_v35, %v5626_v61  ;;  %v1802_v44 = vrot.slane %v1788_v36, %v5626_v61  ;;  %v1370_v45 = vpop.permute.xlu0 %1369  ;;  %v1372_v46 = vpop.permute.xlu1 %1371 }
 0x2be   : > { %v1391_v47 = vcombine.low %v1358_v4, %v1370_v45  ;;  %v1392_v48 = vcombine.high %v1358_v4, %v1370_v45  ;;  %v1459_v49 = vcombine.low %v1360_v16, %v1372_v46  ;;  %v1460_v51 = vcombine.high %v1360_v16, %v1372_v46 }
 0x2bf   : > { %v1875_v62 = vcombine.low %v1779_v41, %v1786_v42  ;;  %v3974_v63 = vcombine.high %v1779_v41, %v1786_v42  ;;  %v1891_v0 = vcombine.low %v1795_v43, %v1802_v44  ;;  %v3975_v1 = vcombine.high %v1795_v43, %v1802_v44 }
 0x2c0   : > { %v1399_v57 = vrot.slane %v1391_v47, %v5623_v54  ;;  %v1406_v58 = vrot.slane %v1392_v48, %v5623_v54  ;;  %v1467_v59 = vrot.slane %v1459_v49, %v5623_v54  ;;  %v1474_v60 = vrot.slane %v1460_v51, %v5623_v54 }
 0x2c1   : > { %v1882_v35 = vrot.slane %v1875_v62, %v5623_v54  ;;  %v1890_v36 = vrot.slane %v3974_v63, %v5623_v54  ;;  %v1898_v41 = vrot.slane %v1891_v0, %v5623_v54  ;;  %v1906_v42 = vrot.slane %v3975_v1, %v5623_v54 }
 0x2c2   : > { %v1407_v2 = vcombine.low %v1383_v52, %v1399_v57  ;;  %v1408_v4 = vcombine.high %v1383_v52, %v1399_v57  ;;  %v1423_v5 = vcombine.low %v1390_v53, %v1406_v58  ;;  %v1424_v6 = vcombine.high %v1390_v53, %v1406_v58 }
 0x2c3   : > { %v1475_v7 = vcombine.low %v1451_v55, %v1467_v59  ;;  %v1476_v8 = vcombine.high %v1451_v55, %v1467_v59  ;;  %v1491_v9 = vcombine.low %v1458_v56, %v1474_v60  ;;  %v1492_v10 = vcombine.high %v1458_v56, %v1474_v60 }
 0x2c4   : > { %v1415_v11 = vrot.slane %v1407_v2, %v5626_v61  ;;  %v1422_v12 = vrot.slane %v1408_v4, %v5626_v61  ;;  %v1431_v13 = vrot.slane %v1423_v5, %v5626_v61  ;;  %v1438_v14 = vrot.slane %v1424_v6, %v5626_v61 }
 0x2c5   : > { %v1483_v15 = vrot.slane %v1475_v7, %v5626_v61  ;;  %v1490_v16 = vrot.slane %v1476_v8, %v5626_v61  ;;  %v1499_v17 = vrot.slane %v1491_v9, %v5626_v61  ;;  %v1506_v18 = vrot.slane %v1492_v10, %v5626_v61 }
 0x2c6   : > { %v1511_v19 = vcombine.low %v1415_v11, %v1422_v12  ;;  %v3968_v20 = vcombine.high %v1415_v11, %v1422_v12  ;;  %v1527_v21 = vcombine.low %v1431_v13, %v1438_v14  ;;  %v3969_v22 = vcombine.high %v1431_v13, %v1438_v14 }
 0x2c7   : > { %v1579_v23 = vcombine.low %v1483_v15, %v1490_v16  ;;  %v3970_v24 = vcombine.high %v1483_v15, %v1490_v16  ;;  %v1595_v25 = vcombine.low %v1499_v17, %v1506_v18  ;;  %v3971_v26 = vcombine.high %v1499_v17, %v1506_v18 }
 0x2c8   : > { %v5677_v27 = vrot.slane %v1511_v19, %v5623_v54  ;;  %v5680_v28 = vrot.slane %v3968_v20, %v5623_v54  ;;  %v5683_v29 = vrot.slane %v1527_v21, %v5623_v54  ;;  %v1542_v30 = vrot.slane %v3969_v22, %v5623_v54 }
 0x2c9   : > { %v1586_v31 = vrot.slane %v1579_v23, %v5623_v54  ;;  %v1594_v32 = vrot.slane %v3970_v24, %v5623_v54  ;;  %v1602_v33 = vrot.slane %v1595_v25, %v5623_v54  ;;  %v1610_v34 = vrot.slane %v3971_v26, %v5623_v54 }
 0x2ca   : > { %v1543_v43 = vcombine.low %v5677_v27, %v5680_v28  ;;  %v1559_v44 = vcombine.low %v5683_v29, %v1542_v30  ;;  %v1839_v47 = vcombine.low %v5645_v37, %v5648_v38  ;;  %v1855_v48 = vcombine.low %v5651_v39, %v5654_v40 }
 0x2cb   : > { %v1611_v45 = vcombine.low %v1586_v31, %v1594_v32  ;;  %v1627_v46 = vcombine.low %v1602_v33, %v1610_v34  ;;  %v1907_v49 = vcombine.low %v1882_v35, %v1890_v36  ;;  %v1923_v51 = vcombine.low %v1898_v41, %v1906_v42 }
 0x2cc   : > { %v1847_v52 = vrot.slane %v1839_v47, %v5626_v61  ;;  %v1863_v53 = vrot.slane %v1855_v48, %v5626_v61  ;;  %v1551_v57 = vrot.slane %v1543_v43, %v5626_v61  ;;  %v1567_v58 = vrot.slane %v1559_v44, %v5626_v61  ;;  %v3959_v43 = vld [vmem:[%s6239_s13] ss:$0 sm:$0xff]  ;;  %v1348_v44 = vpop.f32.mrb[4].mxu0 }
 0x2cd   : > { %v1915_v55 = vrot.slane %v1907_v49, %v5626_v61  ;;  %v1931_v56 = vrot.slane %v1923_v51, %v5626_v61  ;;  %v1619_v59 = vrot.slane %v1611_v45, %v5626_v61  ;;  %v1635_v60 = vrot.slane %v1627_v46, %v5626_v61  ;;  %v4186_v46 = vpop.f32.mrb[5].mxu0 }
 0x2ce   : > { %v1871_v62 = vcombine.low %v1847_v52, %v1863_v53  ;;  %v1575_v1 = vcombine.low %v1551_v57, %v1567_v58  ;;  %v1908_v6 = vcombine.high %v1882_v35, %v1890_v36  ;;  %v1924_v7 = vcombine.high %v1898_v41, %v1906_v42  ;;  %v1351_v47 = vpop.f32.mrb[6].mxu0 }
 0x2cf   : > { %v1939_v63 = vcombine.low %v1915_v55, %v1931_v56  ;;  %v1643_v2 = vcombine.low %v1619_v59, %v1635_v60  ;;  %v1940_v5 = vcombine.high %v1915_v55, %v1931_v56  ;;  %v1872_v8 = vcombine.high %v1847_v52, %v1863_v53  ;;  %v4187_v49 = vpop.f32.mrb[7].mxu0 }
 0x2d0   : > { %v1840_v9 = vcombine.high %v5645_v37, %v5648_v38  ;;  %v1856_v10 = vcombine.high %v5651_v39, %v5654_v40  ;;  %v1922_v13 = vrot.slane %v1908_v6, %v5626_v61  ;;  %v1938_v14 = vrot.slane %v1924_v7, %v5626_v61 }
 0x2d1   : > { %v1943_v0 = vpack.c.bf16 %v1939_v63, %v1871_v62  ;;  %v1647_v11 = vpack.c.bf16 %v1643_v2, %v1575_v1  ;;  %v1944_v12 = vpack.c.bf16 %v1940_v5, %v1872_v8  ;;  %v1544_v37 = vcombine.high %v5677_v27, %v5680_v28 }
 0x2d2   : > { %v1854_v15 = vrot.slane %v1840_v9, %v5626_v61  ;;  %v1870_v16 = vrot.slane %v1856_v10, %v5626_v61  ;;  %v1941_v18 = vcombine.low %v1922_v13, %v1938_v14  ;;  %v1560_v38 = vcombine.high %v5683_v29, %v1542_v30 }
 0x2d3   : > { %v2248_v4 = vsel %vm2243_vm1, %v1943_v0, 0  ;;  %v2295_v17 = vsel %vm2243_vm1, %v1944_v12, 0  ;;  %v1612_v39 = vcombine.high %v1586_v31, %v1594_v32  ;;  %v1628_v40 = vcombine.high %v1602_v33, %v1610_v34 }
 0x2d4   : > { %4189 = vmatpush3.bf16.xpose.msra.mxu1 %v2248_v4  ;;  %v1576_v19 = vcombine.high %v1551_v57, %v1567_v58  ;;  %v1644_v20 = vcombine.high %v1619_v59, %v1635_v60  ;;  %v1873_v21 = vcombine.low %v1854_v15, %v1870_v16  ;;  %v1558_v23 = vrot.slane %v1544_v37, %v5626_v61 }
 0x2d5   : > { %4194 = vmatprep.subr.bf16.mxu1 %v4892_v3  ;;  %v1574_v24 = vrot.slane %v1560_v38, %v5626_v61  ;;  %v1626_v25 = vrot.slane %v1612_v39, %v5626_v61  ;;  %v1642_v26 = vrot.slane %v1628_v40, %v5626_v61  ;;  %v1942_v29 = vcombine.high %v1922_v13, %v1938_v14 }
 0x2d6   : > { %v1945_v22 = vpack.c.bf16 %v1941_v18, %v1873_v21  ;;  %v1648_v27 = vpack.c.bf16 %v1644_v20, %v1576_v19  ;;  %v1874_v32 = vcombine.high %v1854_v15, %v1870_v16  ;;  %v5749_v45 = vadd.f32 %v3959_v43, %v1348_v44 }
 0x2d7   : > { %v1577_v30 = vcombine.low %v1558_v23, %v1574_v24  ;;  %v1645_v31 = vcombine.low %v1626_v25, %v1642_v26  ;;  %v1578_v36 = vcombine.high %v1558_v23, %v1574_v24  ;;  %v1646_v41 = vcombine.high %v1626_v25, %v1642_v26 }
 0x2d8   : > { %v2342_v28 = vsel %vm2243_vm1, %v1945_v22, 0  ;;  %v1946_v33 = vpack.c.bf16 %v1942_v29, %v1874_v32  ;;  %v5751_v48 = vadd.f32 %v3959_v43, %v1351_v47  ;;  %1949 = vrot.lane.b32.xlu1 %v5749_v45, %s4895_s27 }
 0x2d9   : > { %v1649_v34 = vpack.c.bf16 %v1645_v31, %v1577_v30  ;;  %v1650_v42 = vpack.c.bf16 %v1646_v41, %v1578_v36 }
 0x2da   : > { %v2389_v35 = vsel %vm2243_vm1, %v1946_v33, 0 }
 0x2db   : > { %4191 = vmatmul.mubr.msk.bf16.vlgmr.msra.gmra.mrb[4].mxu1 %vm2243_vm1, %v1647_v11 }
 0x2dc   : > { %4195 = vmatpush3.bf16.xpose.msra.mxu1 %v2295_v17  ;;  %4196 = vmatprep.mubr.msk.bf16.mxu1 %vm4893_vm0, %v4892_v3 }
 0x2dd   : > { %4200 = vmatprep.subr.bf16.mxu1 %v4892_v3 }
 0x2e3   : > { %4197 = vmatmul.mubr.msk.bf16.vlgmr.msra.gmra.mrb[8].mxu1 %vm2243_vm1, %v1648_v27 }
 0x2e4   : > { %4201 = vmatpush3.bf16.xpose.msra.mxu1 %v2342_v28  ;;  %4202 = vmatprep.mubr.msk.bf16.mxu1 %vm4893_vm0, %v4892_v3 }
 0x2e5   : > { %4206 = vmatprep.subr.bf16.mxu1 %v4892_v3 }
 0x2eb   : > { %4203 = vmatmul.mubr.msk.bf16.vlgmr.msra.gmra.mrb[12].mxu1 %vm2243_vm1, %v1649_v34 }
 0x2ec   : > { %4207 = vmatpush3.bf16.xpose.msra.mxu1 %v2389_v35  ;;  %4208 = vmatprep.mubr.msk.bf16.mxu1 %vm4893_vm0, %v4892_v3 }
 0x2ed   : > { %4212 = vmatprep.subr.bf16.mxu1 %v4892_v3 }
 0x2f3   : > { %4209 = vmatmul.mubr.msk.bf16.vlgmr.msra.gmra.mrb[16].mxu1 %vm2243_vm1, %v1650_v42 }
 0x2f4   : > { %4214 = vmatprep.mubr.msk.bf16.mxu1 %vm4893_vm0, %v4892_v3 }
 0x34a   : > { %v5769_v14 = vpop.permute.xlu1 %1949 }
 0x3ae   : > { %v2284_v51 = vpop.f32.mrb[4].mxu1 }
 0x3af   : > { %v4192_v52 = vpop.f32.mrb[5].mxu1  ;;  %v2433_v53 = vsel %vm2432_vm2, %v2284_v51, -inf }
 0x3b0   : > { %2434 = vmax.xlane.f32.xlu0 %v2433_v53  ;;  %v2287_v55 = vpop.f32.mrb[6].mxu1 }
 0x3b1   : > { %v4193_v56 = vpop.f32.mrb[7].mxu1  ;;  %v2436_v57 = vsel %vm2432_vm2, %v2287_v55, -inf }
 0x3b2   : > { %2437 = vmax.xlane.f32.xlu1 %v2436_v57 }
 0x3b6   : > { %v2331_v58 = vpop.f32.mrb[8].mxu1 }
 0x3b7   : > { %v4198_v59 = vpop.f32.mrb[9].mxu1  ;;  %v2439_v60 = vsel %vm2432_vm2, %v2331_v58, -inf }
 0x3b8   : > { %2440 = vmax.xlane.f32.xlu0 %v2439_v60  ;;  %v2334_v62 = vpop.f32.mrb[10].mxu1 }
 0x3b9   : > { %v4199_v63 = vpop.f32.mrb[11].mxu1  ;;  %v2442_v0 = vsel %vm2432_vm2, %v2334_v62, -inf }
 0x3bc   : > { %2443 = vmax.xlane.f32.xlu0 %v2442_v0 }
 0x3be   : > { %v2378_v1 = vpop.f32.mrb[12].mxu1 }
 0x3bf   : > { %v4204_v2 = vpop.f32.mrb[13].mxu1  ;;  %v2445_v4 = vsel %vm2432_vm2, %v2378_v1, -inf }
 0x3c0   : > { %v2381_v5 = vpop.f32.mrb[14].mxu1  ;;  %2446 = vmax.xlane.f32.xlu1 %v2445_v4 }
 0x3c1   : > { %v4205_v6 = vpop.f32.mrb[15].mxu1  ;;  %v2448_v7 = vsel %vm2432_vm2, %v2381_v5, -inf }
 0x3c2   : > { %2449 = vmax.xlane.f32.xlu0 %v2448_v7 }
 0x3c6   : > { %v2425_v8 = vpop.f32.mrb[16].mxu1 }
 0x3c7   : > { %v4210_v9 = vpop.f32.mrb[17].mxu1  ;;  %v2451_v10 = vsel %vm2432_vm2, %v2425_v8, -inf }
 0x3c8   : > { %v2428_v11 = vpop.f32.mrb[18].mxu1  ;;  %2452 = vmax.xlane.f32.xlu1 %v2451_v10 }
 0x3c9   : > { %v4211_v12 = vpop.f32.mrb[19].mxu1  ;;  %v2454_v13 = vsel %vm2432_vm2, %v2428_v11, -inf }
 0x3ca   : > { %2455 = vmax.xlane.f32.xlu0 %v2454_v13 }
 0x3d9   : > { %1955 = vrot.lane.b32.xlu1 %v5749_v45, %s4894_s22 }
 0x3dd   : > { %1957 = vrot.lane.b32.xlu1 %v5751_v48, %s4894_s22 }
 0x3e0   : > { %1951 = vrot.lane.b32.xlu0 %v5751_v48, %s4895_s27 }
 0x43d   : > { %v2435_v15 = vpop.xlane.xlu0 %2434 }
 0x43e   : > { %v2457_v16 = vsub.f32 %v2284_v51, %v2435_v15 }
 0x43f   : > { %v2438_v17 = vpop.xlane.xlu1 %2437 }
 0x440   : > { %v2465_v18 = vmul.f32 1.442695, %v2457_v16  ;;  %v2458_v37 = vsub.f32 %v2287_v55, %v2438_v17 }
 0x442   : > { %4489 = vpow2.f32 %v2465_v18  ;;  %v2467_v38 = vmul.f32 1.442695, %v2458_v37 }
 0x444   : > { %4491 = vpow2.f32 %v2467_v38 }
 0x445   : > { %v2441_v21 = vpop.xlane.xlu0 %2440 }
 0x446   : > { %v2459_v26 = vsub.f32 %v2331_v58, %v2441_v21 }
 0x448   : > { %v2469_v29 = vmul.f32 1.442695, %v2459_v26 }
 0x449   : > { %v2444_v22 = vpop.xlane.xlu0 %2443 }
 0x44a   : > { %v2460_v24 = vsub.f32 %v2334_v62, %v2444_v22 }
 0x44c   : > { %v5771_v39 = vpop.eup %4489  ;;  %v2471_v27 = vmul.f32 1.442695, %v2460_v24 }
 0x44d   : > { %v2481_v40 = vsel %vm2432_vm2, %v5771_v39, 0.0  ;;  %v2447_v23 = vpop.xlane.xlu1 %2446 }
 0x44e   : > { %v5775_v19 = vpop.eup %4491  ;;  %2482 = vadd.xlane.f32.xlu1 %v2481_v40  ;;  %v2461_v30 = vsub.f32 %v2378_v1, %v2447_v23  ;;  %4493 = vpow2.f32 %v2471_v27 }
 0x44f   : > { %v2484_v20 = vsel %vm2432_vm2, %v5775_v19, 0.0  ;;  %v2450_v31 = vpop.xlane.xlu0 %2449  ;;  %4495 = vpow2.f32 %v2469_v29 }
 0x450   : > { %2485 = vadd.xlane.f32.xlu0 %v2484_v20  ;;  %v2473_v33 = vmul.f32 1.442695, %v2461_v30  ;;  %v2462_v34 = vsub.f32 %v2381_v5, %v2450_v31 }
 0x452   : > { %v2475_v36 = vmul.f32 1.442695, %v2462_v34 }
 0x455   : > { %v2453_v25 = vpop.xlane.xlu1 %2452 }
 0x456   : > { %v2463_v28 = vsub.f32 %v2425_v8, %v2453_v25 }
 0x457   : > { %v2456_v35 = vpop.xlane.xlu0 %2455 }
 0x458   : > { %v2477_v32 = vmul.f32 1.442695, %v2463_v28  ;;  %v2464_v41 = vsub.f32 %v2428_v11, %v2456_v35  ;;  %v5783_v42 = vpop.eup %4493 }
 0x459   : > { %v5785_v44 = vpop.eup %4495  ;;  %v2490_v46 = vsel %vm2432_vm2, %v5783_v42, 0.0  ;;  %v1956_v59 = vpop.permute.xlu1 %1955 }
 0x45a   : > { %4497 = vpow2.f32 %v2477_v32  ;;  %v2479_v43 = vmul.f32 1.442695, %v2464_v41  ;;  %v2487_v49 = vsel %vm2432_vm2, %v5785_v44, 0.0  ;;  %v1967_v7 = vcombine.low %v5749_v45, %v1956_v59 }
 0x45b   : > { %4499 = vpow2.f32 %v2473_v33  ;;  %v1952_v62 = vpop.permute.xlu0 %1951  ;;  %v1968_v8 = vcombine.high %v5749_v45, %v1956_v59 }
 0x45c   : > { %4501 = vpow2.f32 %v2475_v36  ;;  %v1975_v38 = vrot.slane %v1967_v7, %v5623_v54 }
 0x45d   : > { %4503 = vpow2.f32 %v2479_v43  ;;  %v1958_v60 = vpop.permute.xlu1 %1957 }
 0x45e   : > { %v2035_v0 = vcombine.low %v5751_v48, %v1958_v60  ;;  %v2036_v1 = vcombine.high %v5751_v48, %v1958_v60 }
 0x45f   : > { %1963 = vrot.lane.b32.xlu1 %v5751_v48, %s4896_s9 }
 0x460   : > { %v2043_v9 = vrot.slane %v2035_v0, %v5623_v54  ;;  %v2050_v10 = vrot.slane %v2036_v1, %v5623_v54 }
 0x464   : > { %v5789_v47 = vpop.eup %4497 }
 0x465   : > { %v5793_v51 = vpop.eup %4499  ;;  %v2499_v52 = vsel %vm2432_vm2, %v5789_v47, 0.0 }
 0x466   : > { %1961 = vrot.lane.b32.xlu0 %v5749_v45, %s4896_s9  ;;  %v2493_v53 = vsel %vm2432_vm2, %v5793_v51, 0.0  ;;  %v5799_v55 = vpop.eup %4501  ;;  %v1982_v45 = vrot.slane %v1968_v8, %v5623_v54 }
 0x467   : > { %v2496_v56 = vsel %vm2432_vm2, %v5799_v55, 0.0  ;;  %v5803_v57 = vpop.eup %4503 }
 0x468   : > { %v2502_v58 = vsel %vm2432_vm2, %v5803_v57, 0.0 }
 0x483   : > { %2491 = vadd.xlane.f32.xlu1 %v2490_v46 }
 0x485   : > { %2488 = vadd.xlane.f32.xlu0 %v2487_v49 }
 0x487   : > { %2500 = vadd.xlane.f32.xlu1 %v2499_v52 }
 0x489   : > { %2494 = vadd.xlane.f32.xlu0 %v2493_v53 }
 0x48d   : > { %2497 = vadd.xlane.f32.xlu0 %v2496_v56 }
 0x491   : > { %2503 = vadd.xlane.f32.xlu0 %v2502_v58 }
 0x4db   : > { %v2483_v63 = vpop.xlane.xlu1 %2482 }
 0x4dc   : > { %4505 = vrcp.f32 %v2483_v63 }
 0x4dd   : > { %v2486_v2 = vpop.xlane.xlu0 %2485 }
 0x4de   : > { %4507 = vrcp.f32 %v2486_v2 }
 0x4df   : > { %v1964_v4 = vpop.permute.xlu1 %1963 }
 0x4e0   : > { %v2051_v5 = vcombine.low %v1952_v62, %v1964_v4  ;;  %v2052_v6 = vcombine.high %v1952_v62, %v1964_v4 }
 0x4e1   : > { %v1962_v11 = vpop.permute.xlu0 %1961 }
 0x4e2   : > { %v2059_v12 = vrot.slane %v2051_v5, %v5623_v54  ;;  %v2066_v13 = vrot.slane %v2052_v6, %v5623_v54  ;;  %v1983_v15 = vcombine.low %v5769_v14, %v1962_v11  ;;  %v1984_v48 = vcombine.high %v5769_v14, %v1962_v11 }
 0x4e4   : > { %v2067_v16 = vcombine.low %v2043_v9, %v2059_v12  ;;  %v2068_v17 = vcombine.high %v2043_v9, %v2059_v12  ;;  %v2083_v18 = vcombine.low %v2050_v10, %v2066_v13  ;;  %v2084_v37 = vcombine.high %v2050_v10, %v2066_v13 }
 0x4e5   : > { %v1991_v40 = vrot.slane %v1983_v15, %v5623_v54  ;;  %v1998_v20 = vrot.slane %v1984_v48, %v5623_v54 }
 0x4e6   : > { %v2075_v21 = vrot.slane %v2067_v16, %v5626_v61  ;;  %v2082_v22 = vrot.slane %v2068_v17, %v5626_v61  ;;  %v2091_v23 = vrot.slane %v2083_v18, %v5626_v61  ;;  %v2098_v14 = vrot.slane %v2084_v37, %v5626_v61  ;;  %v4506_v2 = vpop.eup %4505 }
 0x4e7   : > { %v1999_v24 = vcombine.low %v1975_v38, %v1991_v40  ;;  %v2000_v25 = vcombine.high %v1975_v38, %v1991_v40  ;;  %v2015_v26 = vcombine.low %v1982_v45, %v1998_v20  ;;  %v2016_v33 = vcombine.high %v1982_v45, %v1998_v20 }
 0x4e8   : > { %v2171_v27 = vcombine.low %v2075_v21, %v2082_v22  ;;  %v3978_v28 = vcombine.high %v2075_v21, %v2082_v22  ;;  %v2187_v29 = vcombine.low %v2091_v23, %v2098_v14  ;;  %v3979_v30 = vcombine.high %v2091_v23, %v2098_v14  ;;  %v4508_v8 = vpop.eup %4507 }
 0x4e9   : > { %v2007_v31 = vrot.slane %v1999_v24, %v5626_v61  ;;  %v2014_v32 = vrot.slane %v2000_v25, %v5626_v61  ;;  %v2023_v43 = vrot.slane %v2015_v26, %v5626_v61  ;;  %v2030_v46 = vrot.slane %v2016_v33, %v5626_v61 }
 0x4ea   : > { %v2178_v34 = vrot.slane %v2171_v27, %v5623_v54  ;;  %v2186_v35 = vrot.slane %v3978_v28, %v5623_v54  ;;  %v2194_v36 = vrot.slane %v2187_v29, %v5623_v54  ;;  %v2202_v41 = vrot.slane %v3979_v30, %v5623_v54 }
 0x4eb   : > { %v2103_v49 = vcombine.low %v2007_v31, %v2014_v32  ;;  %v3976_v52 = vcombine.high %v2007_v31, %v2014_v32  ;;  %v2119_v60 = vcombine.low %v2023_v43, %v2030_v46  ;;  %v3977_v62 = vcombine.high %v2023_v43, %v2030_v46 }
 0x4ec   : > { %v2203_v53 = vcombine.low %v2178_v34, %v2186_v35  ;;  %v2219_v56 = vcombine.low %v2194_v36, %v2202_v41  ;;  %v2514_v12 = vmul.f32 %v4508_v8, %v5775_v19  ;;  %v2513_v48 = vmul.f32 %v4506_v2, %v5771_v39 }
 0x4ed   : > { %v2110_v58 = vrot.slane %v2103_v49, %v5623_v54  ;;  %v2118_v59 = vrot.slane %v3976_v52, %v5623_v54  ;;  %v2126_v63 = vrot.slane %v2119_v60, %v5623_v54  ;;  %v2134_v0 = vrot.slane %v3977_v62, %v5623_v54  ;;  %v4443_v60 = vld [vmem:[%s5465_s18 + $0x10] sm:$0xff]   ;;  %v4444_v62 = vld [vmem:[%s5465_s18 + $0x18] sm:$0xff]  }
 0x4ee   : > { %v2211_v6 = vrot.slane %v2203_v53, %v5626_v61  ;;  %v2227_v7 = vrot.slane %v2219_v56, %v5626_v61  ;;  %v2521_v17 = vpack.c.bf16 %v2514_v12, %v2513_v48  ;;  %v2204_v40 = vcombine.high %v2178_v34, %v2186_v35 }
 0x4ef   : > { %v2135_v1 = vcombine.low %v2110_v58, %v2118_v59  ;;  %v2151_v5 = vcombine.low %v2126_v63, %v2134_v0  ;;  %v2136_v38 = vcombine.high %v2110_v58, %v2118_v59  ;;  %v2152_v39 = vcombine.high %v2126_v63, %v2134_v0  ;;  %v4442_v59 = vld [vmem:[%s5465_s18 + $0x8] sm:$0xff]  }
 0x4f0   : > { %v2235_v11 = vcombine.low %v2211_v6, %v2227_v7  ;;  %v2236_v16 = vcombine.high %v2211_v6, %v2227_v7  ;;  %v2220_v20 = vcombine.high %v2194_v36, %v2202_v41  ;;  %v2218_v24 = vrot.slane %v2204_v40, %v5626_v61 }
 0x4f1   : > { %v2143_v4 = vrot.slane %v2135_v1, %v5626_v61  ;;  %v2159_v9 = vrot.slane %v2151_v5, %v5626_v61  ;;  %v2150_v21 = vrot.slane %v2136_v38, %v5626_v61  ;;  %v2166_v22 = vrot.slane %v2152_v39, %v5626_v61 }
 0x4f2   : > { %v2234_v25 = vrot.slane %v2220_v20, %v5626_v61 }
 0x4f3   : > { %v2167_v10 = vcombine.low %v2143_v4, %v2159_v9  ;;  %v2168_v15 = vcombine.high %v2143_v4, %v2159_v9  ;;  %v2169_v27 = vcombine.low %v2150_v21, %v2166_v22 }
 0x4f4   : > { %v2237_v32 = vcombine.low %v2218_v24, %v2234_v25  ;;  %v2238_v43 = vcombine.high %v2218_v24, %v2234_v25 }
 0x4f5   : > { %v2239_v13 = vpack.c.bf16 %v2235_v11, %v2167_v10  ;;  %v2240_v18 = vpack.c.bf16 %v2236_v16, %v2168_v15 }
 0x4f6   : > { %v2241_v34 = vpack.c.bf16 %v2237_v32, %v2169_v27 }
 0x4f7   : > { %4213 = vmatpush3.bf16.msra.mxu1 %v2239_v13 }
 0x4f8   : > { %4218 = vmatprep.subr.bf16.mxu1 %v4892_v3 }
 0x4fa   : > { %4215 = vmatmul.mubr.msk.bf16.vlgmr.msra.gmra.mrb[20].mxu1 %vm2432_vm2, %v2521_v17 }
 0x4fb   : > { %4219 = vmatpush3.bf16.msra.mxu1 %v2240_v18  ;;  %4220 = vmatprep.mubr.msk.bf16.mxu1 %vm4893_vm0, %v4892_v3 }
 0x4fc   : > { %4224 = vmatprep.subr.bf16.mxu1 %v4892_v3 }
 0x510   : > { %v2492_v37 = vpop.xlane.xlu1 %2491 }
 0x511   : > { %4509 = vrcp.f32 %v2492_v37 }
 0x512   : > { %v2489_v19 = vpop.xlane.xlu0 %2488 }
 0x513   : > { %4511 = vrcp.f32 %v2489_v19 }
 0x514   : > { %v2501_v30 = vpop.xlane.xlu1 %2500 }
 0x516   : > { %v2495_v45 = vpop.xlane.xlu0 %2494 }
 0x517   : > { %4513 = vrcp.f32 %v2495_v45 }
 0x51a   : > { %v2498_v23 = vpop.xlane.xlu0 %2497 }
 0x51b   : > { %v4510_v14 = vpop.eup %4509  ;;  %4515 = vrcp.f32 %v2498_v23 }
 0x51c   : > { %v2516_v28 = vmul.f32 %v4510_v14, %v5783_v42  ;;  %v2170_v42 = vcombine.high %v2150_v21, %v2166_v22 }
 0x51d   : > { %v4512_v26 = vpop.eup %4511 }
 0x51e   : > { %v2515_v29 = vmul.f32 %v4512_v26, %v5785_v44  ;;  %v2504_v31 = vpop.xlane.xlu0 %2503  ;;  %v2242_v52 = vpack.c.bf16 %v2238_v43, %v2170_v42 }
 0x51f   : > { %4517 = vrcp.f32 %v2504_v31 }
 0x520   : > { %v2522_v33 = vpack.c.bf16 %v2516_v28, %v2515_v29  ;;  %4519 = vrcp.f32 %v2501_v30 }
 0x521   : > { %v4514_v35 = vpop.eup %4513 }
 0x522   : > { %4221 = vmatmul.mubr.msk.bf16.vlgmr.msra.gmra.mrb[24].mxu1 %vm2432_vm2, %v2522_v33  ;;  %v2517_v44 = vmul.f32 %v4514_v35, %v5793_v51 }
 0x523   : > { %4225 = vmatpush3.bf16.msra.mxu1 %v2241_v34  ;;  %4226 = vmatprep.mubr.msk.bf16.mxu1 %vm4893_vm0, %v4892_v3 }
 0x524   : > { %4230 = vmatprep.subr.bf16.mxu1 %v4892_v3 }
 0x525   : > { %v4516_v36 = vpop.eup %4515 }
 0x526   : > { %v2518_v41 = vmul.f32 %v4516_v36, %v5799_v55  ;;  %v4441_v55 = vld [vmem:[%s5465_s18] sm:$0xff]  }
 0x527   : > { %4237 = vmatpush3.bf16.msra.mxu0 %v4441_v55 }
 0x528   : > { %v2523_v46 = vpack.c.bf16 %v2518_v41, %v2517_v44  ;;  %4238 = vmatprep.subr.bf16.mxu0 %v4892_v3 }
 0x529   : > { %v4518_v49 = vpop.eup %4517 }
 0x52a   : > { %4227 = vmatmul.mubr.msk.bf16.vlgmr.msra.gmra.mrb[28].mxu1 %vm2432_vm2, %v2523_v46  ;;  %v4520_v53 = vpop.eup %4519  ;;  %v2520_v56 = vmul.f32 %v4518_v49, %v5803_v57  ;;  %v4445_v57 = vld [vmem:[%s5465_s18 + $0x20] sm:$0xff]  }
 0x52b   : > { %4231 = vmatpush3.bf16.msra.mxu1 %v2242_v52  ;;  %4232 = vmatprep.mubr.msk.bf16.mxu1 %vm4893_vm0, %v4892_v3  ;;  %v2519_v51 = vmul.f32 %v4520_v53, %v5789_v47  ;;  %v4446_v47 = vld [vmem:[%s5465_s18 + $0x28] sm:$0xff]  }
 0x52c   : > { %4239 = vmatpush3.bf16.msra.mxu0 %v4442_v59 }
 0x52d   : > { %v2524_v58 = vpack.c.bf16 %v2520_v56, %v2519_v51  ;;  %4240 = vmatprep.subr.bf16.mxu0 %v4892_v3 }
 0x530   : > { %4241 = vmatpush3.bf16.msra.mxu0 %v4443_v60 }
 0x531   : > { %4242 = vmatprep.subr.bf16.mxu0 %v4892_v3 }
 0x532   : > { %4233 = vmatmul.mubr.msk.bf16.vlgmr.msra.gmra.mrb[32].mxu1 %vm2432_vm2, %v2524_v58 }
 0x534   : > { %4243 = vmatpush3.bf16.msra.mxu0 %v4444_v62 }
 0x535   : > { %4244 = vmatprep.subr.bf16.mxu0 %v4892_v3 }
 0x538   : > { %4245 = vmatpush3.bf16.msra.mxu0 %v4445_v57 }
 0x539   : > { %4246 = vmatprep.subr.bf16.mxu0 %v4892_v3 }
 0x53c   : > { %4247 = vmatpush3.bf16.msra.mxu0 %v4446_v47 }
 0x53d   : > { %4248 = vmatprep.subr.bf16.mxu0 %v4892_v3 }
 0x5cd   : > { %v2562_v63 = vpop.f32.mrb[20].mxu1 }
 0x5ce   : > { %v4216_v0 = vpop.f32.mrb[21].mxu1 }
 0x5cf   : > { %v2565_v1 = vpop.f32.mrb[22].mxu1 }
 0x5d0   : > { %v4217_v2 = vpop.f32.mrb[23].mxu1 }
 0x5f5   : > { %v2606_v4 = vpop.f32.mrb[24].mxu1 }
 0x5f6   : > { %v4222_v5 = vpop.f32.mrb[25].mxu1 }
 0x5f7   : > { %v2609_v6 = vpop.f32.mrb[26].mxu1 }
 0x5f8   : > { %v4223_v7 = vpop.f32.mrb[27].mxu1 }
 0x5fd   : > { %v2650_v8 = vpop.f32.mrb[28].mxu1 }
 0x5fe   : > { %v2701_v9 = vcombine.low %v2562_v63, %v2650_v8  ;;  %v2702_v10 = vcombine.high %v2562_v63, %v2650_v8  ;;  %v4228_v11 = vpop.f32.mrb[29].mxu1 }
 0x5ff   : > { %v2653_v12 = vpop.f32.mrb[30].mxu1 }
 0x600   : > { %v2769_v13 = vcombine.low %v2565_v1, %v2653_v12  ;;  %v2770_v15 = vcombine.high %v2565_v1, %v2653_v12  ;;  %v4229_v48 = vpop.f32.mrb[31].mxu1  ;;  %v2709_v19 = vrot.slane %v2701_v9, %v5623_v54  ;;  %v2716_v38 = vrot.slane %v2702_v10, %v5623_v54 }
 0x602   : > { %v2777_v26 = vrot.slane %v2769_v13, %v5623_v54  ;;  %v2784_v27 = vrot.slane %v2770_v15, %v5623_v54 }
 0x605   : > { %v2694_v16 = vpop.f32.mrb[32].mxu1 }
 0x606   : > { %v2717_v17 = vcombine.low %v2606_v4, %v2694_v16  ;;  %v2718_v18 = vcombine.high %v2606_v4, %v2694_v16  ;;  %v4234_v37 = vpop.f32.mrb[33].mxu1  ;;  %v4447_v4 = vld [vmem:[%s5465_s18 + $0x30] sm:$0xff]  }
 0x607   : > { %v2697_v39 = vpop.f32.mrb[34].mxu1  ;;  %4249 = vmatpush3.bf16.msra.mxu0 %v4447_v4 }
 0x608   : > { %v2725_v45 = vrot.slane %v2717_v17, %v5623_v54  ;;  %v2732_v40 = vrot.slane %v2718_v18, %v5623_v54  ;;  %v2785_v20 = vcombine.low %v2609_v6, %v2697_v39  ;;  %v2786_v21 = vcombine.high %v2609_v6, %v2697_v39  ;;  %v4235_v22 = vpop.f32.mrb[35].mxu1  ;;  %4250 = vmatprep.subr.bf16.mxu0 %v4892_v3 }
 0x60a   : > { %v2733_v23 = vcombine.low %v2709_v19, %v2725_v45  ;;  %v2734_v14 = vcombine.high %v2709_v19, %v2725_v45  ;;  %v2749_v24 = vcombine.low %v2716_v38, %v2732_v40  ;;  %v2750_v25 = vcombine.high %v2716_v38, %v2732_v40  ;;  %v4448_v40 = vld [vmem:[%s5465_s18 + $0x38] sm:$0xff]   ;;  %s6240_s18 = sld [smem:[#allocation41_spill]] }
 0x60b   : > { %v2793_v28 = vrot.slane %v2785_v20, %v5623_v54  ;;  %v2800_v29 = vrot.slane %v2786_v21, %v5623_v54  ;;  %4251 = vmatpush3.bf16.msra.mxu0 %v4448_v40  ;;  %v4476_v40 = vld [vmem:[%s5519_s1 + $0x8] sm:$0xff]  }
 0x60c   : > { %v2741_v30 = vrot.slane %v2733_v23, %v5626_v61  ;;  %v2748_v31 = vrot.slane %v2734_v14, %v5626_v61  ;;  %v2757_v32 = vrot.slane %v2749_v24, %v5626_v61  ;;  %v2764_v33 = vrot.slane %v2750_v25, %v5626_v61 }
 0x60d   : > { %v2801_v34 = vcombine.low %v2777_v26, %v2793_v28  ;;  %v2802_v35 = vcombine.high %v2777_v26, %v2793_v28  ;;  %v2817_v36 = vcombine.low %v2784_v27, %v2800_v29  ;;  %v2818_v42 = vcombine.high %v2784_v27, %v2800_v29 }
 0x60e   : > { %v2837_v44 = vcombine.low %v2741_v30, %v2748_v31  ;;  %v3988_v41 = vcombine.high %v2741_v30, %v2748_v31  ;;  %v2853_v43 = vcombine.low %v2757_v32, %v2764_v33  ;;  %v3989_v46 = vcombine.high %v2757_v32, %v2764_v33 }
 0x60f   : > { %v2809_v49 = vrot.slane %v2801_v34, %v5626_v61  ;;  %v2816_v52 = vrot.slane %v2802_v35, %v5626_v61  ;;  %v2825_v53 = vrot.slane %v2817_v36, %v5626_v61  ;;  %v2832_v56 = vrot.slane %v2818_v42, %v5626_v61 }
 0x610   : > { %v2844_v51 = vrot.slane %v2837_v44, %v5623_v54  ;;  %v2852_v58 = vrot.slane %v3988_v41, %v5623_v54  ;;  %v2860_v55 = vrot.slane %v2853_v43, %v5623_v54  ;;  %v2868_v59 = vrot.slane %v3989_v46, %v5623_v54  ;;  %v3992_v43 = vld [vmem:[%s6242_s7] ss:$0 sm:$0xff] }
 0x611   : > { %v2905_v60 = vcombine.low %v2809_v49, %v2816_v52  ;;  %v3990_v62 = vcombine.high %v2809_v49, %v2816_v52  ;;  %v2921_v57 = vcombine.low %v2825_v53, %v2832_v56  ;;  %v3991_v47 = vcombine.high %v2825_v53, %v2832_v56 }
 0x612   : > { %v2870_v63 = vcombine.high %v2844_v51, %v2852_v58  ;;  %v2886_v0 = vcombine.high %v2860_v55, %v2868_v59  ;;  %v2869_v1 = vcombine.low %v2844_v51, %v2852_v58  ;;  %v2885_v2 = vcombine.low %v2860_v55, %v2868_v59  ;;  %v4529_v58 = vld [vmem:[#allocation2] sm:$0xff]  ;;  %v4530_v59 = vld [vmem:[#allocation2 + $0x8] sm:$0xff] }
 0x613   : > { %v2912_v5 = vrot.slane %v2905_v60, %v5623_v54  ;;  %v2920_v6 = vrot.slane %v3990_v62, %v5623_v54  ;;  %v2928_v7 = vrot.slane %v2921_v57, %v5623_v54  ;;  %v2936_v8 = vrot.slane %v3991_v47, %v5623_v54  ;;  %v4449_v62 = vld [vmem:[%s6240_s18] ss:$8 sps:$4 sm:$0xff]   ;;  %v4451_v57 = vld [vmem:[%s6240_s18 + $0x4] ss:$8 sps:$4 sm:$0xff]   ;;  %v4454_v47 = vld [vmem:[%s6240_s18 + $0x14] ss:$8 sps:$4 sm:$0xff]  }
 0x614   : > { %v2884_v9 = vrot.slane %v2870_v63, %v5626_v61  ;;  %v2900_v10 = vrot.slane %v2886_v0, %v5626_v61  ;;  %v2877_v11 = vrot.slane %v2869_v1, %v5626_v61  ;;  %v2893_v12 = vrot.slane %v2885_v2, %v5626_v61  ;;  %3270 = vmatprep.subr.bf16.mxu1 %v4451_v57  ;;  %v4452_v63 = vld [vmem:[%s6240_s18 + $0x10] ss:$8 sps:$4 sm:$0xff]  }
 0x615   : > { %v2938_v13 = vcombine.high %v2912_v5, %v2920_v6  ;;  %v2954_v15 = vcombine.high %v2928_v7, %v2936_v8  ;;  %v2937_v48 = vcombine.low %v2912_v5, %v2920_v6  ;;  %v2953_v16 = vcombine.low %v2928_v7, %v2936_v8  ;;  %3271 = vmatpush1.bf16.msra.mxu1 %v4449_v62 }
 0x616   : > { %v2903_v17 = vcombine.low %v2884_v9, %v2900_v10  ;;  %v2901_v18 = vcombine.low %v2877_v11, %v2893_v12  ;;  %v2902_v37 = vcombine.high %v2877_v11, %v2893_v12  ;;  %v2904_v54 = vcombine.high %v2884_v9, %v2900_v10  ;;  %3272 = vmatprep.subr.bf16.mxu1 %v4454_v47  ;;  %v4457_v9 = vld [vmem:[%s6240_s18 + $0x24] ss:$8 sps:$4 sm:$0xff]   ;;  %v4455_v10 = vld [vmem:[%s6240_s18 + $0x20] ss:$8 sps:$4 sm:$0xff]   ;;  %v4460_v11 = vld [vmem:[%s6240_s18 + $0x34] ss:$8 sps:$4 sm:$0xff]  }
 0x617   : > { %v2952_v19 = vrot.slane %v2938_v13, %v5626_v61  ;;  %v2968_v38 = vrot.slane %v2954_v15, %v5626_v61  ;;  %v2945_v39 = vrot.slane %v2937_v48, %v5626_v61  ;;  %v2961_v45 = vrot.slane %v2953_v16, %v5626_v61  ;;  %v4458_v12 = vld [vmem:[%s6240_s18 + $0x30] ss:$8 sps:$4 sm:$0xff]   ;;  %v4461_v13 = vld [vmem:[%s6240_s18 + $0x40] ss:$8 sps:$4 sm:$0xff]   ;;  %v4463_v15 = vld [vmem:[%s6240_s18 + $0x44] ss:$8 sps:$4 sm:$0xff]  }
 0x618   : > { %v4466_v48 = vld [vmem:[%s6240_s18 + $0x54] ss:$8 sps:$4 sm:$0xff]   ;;  %v4464_v16 = vld [vmem:[%s6240_s18 + $0x50] ss:$8 sps:$4 sm:$0xff]  }
 0x619   : > { %v2971_v20 = vcombine.low %v2952_v19, %v2968_v38  ;;  %v2970_v21 = vcombine.high %v2945_v39, %v2961_v45  ;;  %v2969_v22 = vcombine.low %v2945_v39, %v2961_v45  ;;  %v2972_v23 = vcombine.high %v2952_v19, %v2968_v38  ;;  %3273 = vmatpush1.bf16.msra.mxu1 %v4452_v63  ;;  %v4473_v19 = vld [vmem:[%s5519_s1 + $0x40] sm:$0xff]   ;;  %v4475_v39 = vld [vmem:[%s5519_s1 + $0x48] sm:$0xff]  }
 0x61a   : > { %3274 = vmatprep.subr.bf16.mxu1 %v4457_v9  ;;  %v4474_v38 = vld [vmem:[%s5519_s1] sm:$0xff]   ;;  %4106 = vmatprep.subr.bf16.mxu0 %v4473_v19 }
 0x61b   : > { %v4407_v14 = vpack.i.bf16 %v2971_v20, %v2903_v17  ;;  %v4402_v3 = vpack.i.bf16 %v2970_v21, %v2902_v37  ;;  %v4412_v24 = vpack.i.bf16 %v2972_v23, %v2904_v54  ;;  %v4899_v17 = vmov 0   ;;  %v4467_v37 = vld [vmem:[%s6240_s18 + $0x60] ss:$8 sps:$4 sm:$0xff]   ;;  %v4472_v54 = vld [vmem:[%s6240_s18 + $0x74] ss:$8 sps:$4 sm:$0xff]  }
 0x61c   : > { %3302 = vmatprep.mubr.bf16.mxu1 %v4899_v17  ;;  %v4470_v45 = vld [vmem:[%s6240_s18 + $0x70] ss:$8 sps:$4 sm:$0xff]   ;;  %v4477_v20 = vld [vmem:[%s5519_s1 + $0x50] sm:$0xff]   ;;  %v4480_v23 = vld [vmem:[%s5519_s1 + $0x18] sm:$0xff]  }
 0x61d   : > { %4408 = vrot.lane.b32.xlu0 %v4407_v14, %s4894_s22  ;;  %4403 = vrot.lane.b32.xlu1 %v4402_v3, %s4896_s9  ;;  %v4478_v21 = vld [vmem:[%s5519_s1 + $0x10] sm:$0xff]   ;;  %v4481_v14 = vld [vmem:[%s5519_s1 + $0x60] sm:$0xff]   ;;  %s6249_s9 = sld [smem:[#allocation26_spill]] }
 0x61e   : > { %3275 = vmatpush1.bf16.msra.mxu1 %v4455_v10  ;;  %v4482_v3 = vld [vmem:[%s5519_s1 + $0x20] sm:$0xff]  }
 0x61f   : > { %3276 = vmatprep.subr.bf16.mxu1 %v4460_v11 }
 0x621   : > { %4413 = vrot.lane.b32.xlu1 %v4412_v24, %s4895_s27  ;;  %v4483_v24 = vld [vmem:[%s5519_s1 + $0x68] sm:$0xff]  }
 0x622   : > { %3277 = vmatpush1.bf16.msra.mxu1 %v4458_v12 }
 0x623   : > { %3278 = vmatprep.subr.bf16.mxu1 %v4463_v15  ;;  %p4038_p1 = scmp.ne.s32.totalorder %s6249_s9, 1 }
 0x624   : > { %s6251_s29 = sld [smem:[#allocation60_spill]] (!%p4038_p1) }
 0x626   : > { %3279 = vmatpush1.bf16.msra.mxu1 %v4461_v13 }
 0x627   : > { %3280 = vmatprep.subr.bf16.mxu1 %v4466_v48 }
 0x62a   : > { %3281 = vmatpush1.bf16.msra.mxu1 %v4464_v16 }
 0x68f   : > { %v4409_v25 = vpop.permute.xlu0 %4408  ;;  %v4404_v26 = vpop.permute.xlu1 %4403 }
 0x690   : > { %v4406_v27 = vunpack.i.h.bf16 %v4404_v26  ;;  %v4405_v28 = vunpack.i.l.bf16 %v4404_v26  ;;  %v4411_v61 = vunpack.i.h.bf16 %v4409_v25  ;;  %v4410_v29 = vunpack.i.l.bf16 %v4409_v25 }
 0x692   : > { %v2997_v30 = vsel %vm2243_vm1, %v2901_v18, %v4405_v28  ;;  %v2998_v31 = vsel %vm2243_vm1, %v2969_v22, %v4406_v27  ;;  %v4469_v18 = vld [vmem:[%s6240_s18 + $0x64] ss:$8 sps:$4 sm:$0xff]  }
 0x693   : > { %v4414_v32 = vpop.permute.xlu1 %4413  ;;  %v3000_v35 = vsel %vm2999_vm3, %v2997_v30, %v4410_v29  ;;  %v3001_v36 = vsel %vm2999_vm3, %v2998_v31, %v4411_v61  ;;  %3282 = vmatprep.subr.bf16.mxu1 %v4469_v18  ;;  %v4479_v22 = vld [vmem:[%s5519_s1 + $0x58] sm:$0xff]   ;;  %v4001_v31 = vld [vmem:[%s997_s26] ss:$0 sm:$0xff]  ;;  %s6245_s26 = sld [smem:[#allocation54_spill]] }
 0x694   : > { %v4416_v33 = vunpack.i.h.bf16 %v4414_v32  ;;  %v4415_v34 = vunpack.i.l.bf16 %v4414_v32  ;;  %3283 = vmatpush1.bf16.msra.mxu1 %v4467_v37 }
 0x695   : > { %3284 = vmatprep.subr.bf16.mxu1 %v4472_v54 }
 0x696   : > { %v3003_v42 = vsel %vm3002_vm4, %v3000_v35, %v4415_v34  ;;  %v3004_v44 = vsel %vm3002_vm4, %v3001_v36, %v4416_v33  ;;  %v4002_v36 = vld [vmem:[%s1000_s20] ss:$0 sm:$0xff] }
 0x697   : > { %v3005_v41 = vpack.c.bf16 %v3004_v44, %v3003_v42 }
 0x698   : > { %3285 = vmatpush1.bf16.msra.mxu1 %v4470_v45 }
 0x699   : > { %4253 = vmatmul.mubr.bf16.vlgmr.msra.gmra.mrb[8].mxu0 %v3005_v41  ;;  %s6246_s20 = scalar_lea.vmem %s6245_s26, %s5475_s4 }
 0x69a   : > { %4107 = vmatpush3.bf16.msra.mxu0 %v4474_v38  ;;  %v4019_v11 = vld [vmem:[%s6246_s20] ss:$0 sm:$0xff] }
 0x69b   : > { %4108 = vmatprep.subr.bf16.mxu0 %v4475_v39 }
 0x69e   : > { %4109 = vmatpush3.bf16.msra.mxu0 %v4476_v40 }
 0x69f   : > { %4110 = vmatprep.subr.bf16.mxu0 %v4477_v20 }
 0x6a2   : > { %4111 = vmatpush3.bf16.msra.mxu0 %v4478_v21 }
 0x6a3   : > { %4112 = vmatprep.subr.bf16.mxu0 %v4479_v22 }
 0x6a6   : > { %4113 = vmatpush3.bf16.msra.mxu0 %v4480_v23 }
 0x6a7   : > { %4114 = vmatprep.subr.bf16.mxu0 %v4481_v14 }
 0x6aa   : > { %4115 = vmatpush3.bf16.msra.mxu0 %v4482_v3 }
 0x6ab   : > { %4116 = vmatprep.subr.bf16.mxu0 %v4483_v24 }
 0x76c   : > { %v3111_v46 = vpop.f32.mrb[8].mxu0 }
 0x76d   : > { %v3112_v49 = vadd.f32 %v3992_v43, %v3111_v46  ;;  %v4254_v52 = vpop.f32.mrb[9].mxu0  ;;  %v4484_v46 = vld [vmem:[%s5519_s1 + $0x28] sm:$0xff]  }
 0x76e   : > { %v3114_v53 = vpop.f32.mrb[10].mxu0  ;;  %4117 = vmatpush3.bf16.msra.mxu0 %v4484_v46  ;;  %v4486_v52 = vld [vmem:[%s5519_s1 + $0x30] sm:$0xff]  }
 0x76f   : > { %v3115_v56 = vadd.f32 %v3992_v43, %v3114_v53  ;;  %v4255_v51 = vpop.f32.mrb[11].mxu0  ;;  %v3118_v55 = vadd.f32 %v4529_v58, %v3112_v49  ;;  %v4485_v49 = vld [vmem:[%s5519_s1 + $0x70] sm:$0xff]   ;;  %v4487_v53 = vld [vmem:[%s5519_s1 + $0x78] sm:$0xff]  }
 0x770   : > { %4118 = vmatprep.subr.bf16.mxu0 %v4485_v49  ;;  %v3182_v51 = vsub.s32 0, %v5620_v50  ;;  %v3178_v58 = vld [vmem:[%s5501_s30] sm:$0x3] }
 0x771   : > { %3122 = vadd.xlane.f32.xlu1 %v3118_v55  ;;  %v3119_v60 = vadd.f32 %v4530_v59, %v3115_v56  ;;  %v4488_v56 = vld [vmem:[%s5519_s1 + $0x38] sm:$0xff]  }
 0x772   : > { %4119 = vmatpush3.bf16.msra.mxu0 %v4486_v52  ;;  %v3183_v59 = vrot.slane %v3178_v58, %v3182_v51 }
 0x773   : > { %3124 = vadd.xlane.f32.xlu0 %v3119_v60  ;;  %4120 = vmatprep.subr.bf16.mxu0 %v4487_v53 }
 0x776   : > { %4121 = vmatpush3.bf16.msra.mxu0 %v4488_v56 }
 0x7fe   : > { %v3123_v0 = vpop.xlane.xlu1 %3122 }
 0x7ff   : > { %v3127_v1 = vmul.f32 0.0078125, %v3123_v0 }
 0x800   : > { %v3125_v2 = vpop.xlane.xlu0 %3124 }
 0x801   : > { %v5927_v4 = vsub.f32 %v3118_v55, %v3127_v1  ;;  %v3128_v5 = vmul.f32 0.0078125, %v3125_v2  ;;  %v3186_v55 = vsub.s32 1, %v5620_v50 }
 0x803   : > { %v5929_v6 = vsub.f32 %v3119_v60, %v3128_v5  ;;  %v3131_v7 = vmul.f32 %v5927_v4, %v5927_v4  ;;  %v3187_v60 = vrot.slane %v3178_v58, %v3186_v55 }
 0x805   : > { %3133 = vadd.xlane.f32.xlu0 %v3131_v7  ;;  %v3132_v8 = vmul.f32 %v5929_v6, %v5929_v6 }
 0x807   : > { %3135 = vadd.xlane.f32.xlu1 %v3132_v8 }
 0x892   : > { %v3134_v25 = vpop.xlane.xlu0 %3133 }
 0x893   : > { %v3137_v26 = vmul.f32 0.0078125, %v3134_v25 }
 0x894   : > { %v3136_v27 = vpop.xlane.xlu1 %3135 }
 0x895   : > { %v3139_v28 = vadd.f32 1e-05, %v3137_v26  ;;  %v3138_v61 = vmul.f32 0.0078125, %v3136_v27 }
 0x897   : > { %4521 = vrsqrt.f32 %v3139_v28  ;;  %v3140_v29 = vadd.f32 1e-05, %v3138_v61  ;;  %v4036_v28 = vld [vmem:[%s1003_s8] ss:$0 sm:$0xff] }
 0x899   : > { %4523 = vrsqrt.f32 %v3140_v29 }
 0x8a1   : > { %v4522_v30 = vpop.eup %4521 }
 0x8a2   : > { %v3143_v32 = vmul.f32 %v4522_v30, %v5927_v4  ;;  %v4037_v30 = vld [vmem:[%s1006_s12] ss:$0 sm:$0xff]  ;;  %s6250_s12 = sld [smem:[#allocation59_spill]] (!%p4038_p1) }
 0x8a3   : > { %v4524_v33 = vpop.eup %4523 }
 0x8a4   : > { %v3144_v34 = vmul.f32 %v4524_v33, %v5929_v6  ;;  %v3151_v35 = vmul.f32 %v4001_v31, %v3143_v32 }
 0x8a6   : > { %v3152_v42 = vmul.f32 %v4001_v31, %v3144_v34  ;;  %v3159_v44 = vadd.f32 %v4002_v36, %v3151_v35 }
 0x8a8   : > { %v3160_v41 = vadd.f32 %v4002_v36, %v3152_v42 }
 0x8aa   : > { %v3161_v43 = vpack.c.bf16 %v3160_v41, %v3159_v44 }
 0x8ac   : > { %3303 = vmatmul.mubr.bf16.vlgmr.msra.gmra.mrb[36].mxu1 %v3161_v43 }
 0x97f   : > { %v3304_v62 = vpop.f32.mrb[36].mxu1 }
 0x980   : > { %v3305_v57 = vadd.f32 %v3304_v62, %v3183_v59  ;;  %v3306_v47 = vpop.f32.mrb[37].mxu1  ;;  %v4039_v62 = vld [vmem:[%s6250_s12] ss:$0 sm:$0xff] (!%p4038_p1) }
 0x981   : > { %v3307_v63 = vadd.f32 %v3306_v47, %v3187_v60  ;;  %v3308_v0 = vpop.f32.mrb[38].mxu1  ;;  %v4040_v47 = vld [vmem:[%s6251_s29] ss:$0 sm:$0xff] (!%p4038_p1) }
 0x982   : > { %v3309_v1 = vadd.f32 %v3308_v0, %v3183_v59  ;;  %v3310_v2 = vpop.f32.mrb[39].mxu1  ;;  %v3313_v5 = vmax.f32 %v3305_v57, 0.0 }
 0x983   : > { %v3311_v4 = vadd.f32 %v3310_v2, %v3187_v60  ;;  %v3314_v7 = vmax.f32 %v3307_v63, 0.0 }
 0x984   : > { %v3315_v6 = vmax.f32 %v3309_v1, 0.0 }
 0x985   : > { %v3316_v8 = vmax.f32 %v3311_v4, 0.0 }
 0x986   : > { %v3317_v9 = vpack.c.bf16 %v3315_v6, %v3313_v5 }
 0x987   : > { %v3318_v10 = vpack.c.bf16 %v3316_v8, %v3314_v7 }
 0x989   : > { %3486 = vmatprep.mubr.bf16.mxu0 %v3318_v10 }
 0x98a   : > { %3487 = vmatmul.mubr.bf16.vlgmr.msra.gmra.mrb[12].mxu0 %v3317_v9 }
 0xa5d   : > { %v4122_v50 = vpop.f32.mrb[12].mxu0 }
 0xa5e   : > { %v4123_v12 = vpop.f32.mrb[13].mxu0 }
 0xa5f   : > { %v4124_v13 = vadd.f32 %v4123_v12, %v4122_v50  ;;  %v4125_v15 = vpop.f32.mrb[14].mxu0 }
 0xa60   : > { %v4126_v48 = vpop.f32.mrb[15].mxu0 }
 0xa61   : > { %v3489_v16 = vadd.f32 %v4124_v13, %v4019_v11  ;;  %v4127_v17 = vadd.f32 %v4126_v48, %v4125_v15 }
 0xa63   : > { %v3492_v18 = vadd.f32 %v4127_v17, %v4019_v11  ;;  %v3495_v37 = vadd.f32 %v3489_v16, %v3159_v44 }
 0xa65   : > { %3499 = vadd.xlane.f32.xlu0 %v3495_v37  ;;  %v3496_v54 = vadd.f32 %v3492_v18, %v3160_v41 }
 0xa67   : > { %3501 = vadd.xlane.f32.xlu1 %v3496_v54 }
 0xaf2   : > { %v3500_v19 = vpop.xlane.xlu0 %3499 }
 0xaf3   : > { %v3503_v38 = vmul.f32 0.0078125, %v3500_v19 }
 0xaf4   : > { %v3502_v39 = vpop.xlane.xlu1 %3501 }
 0xaf5   : > { %v3505_v45 = vsub.f32 %v3495_v37, %v3503_v38  ;;  %v3504_v40 = vmul.f32 0.0078125, %v3502_v39 }
 0xaf7   : > { %v3506_v20 = vsub.f32 %v3496_v54, %v3504_v40  ;;  %v3507_v21 = vmul.f32 %v3505_v45, %v3505_v45 }
 0xaf9   : > { %3509 = vadd.xlane.f32.xlu0 %v3507_v21  ;;  %v3508_v22 = vmul.f32 %v3506_v20, %v3506_v20 }
 0xafb   : > { %3511 = vadd.xlane.f32.xlu1 %v3508_v22 }
 0xb86   : > { %v3510_v23 = vpop.xlane.xlu0 %3509 }
 0xb87   : > { %v3513_v14 = vmul.f32 0.0078125, %v3510_v23 }
 0xb88   : > { %v3512_v3 = vpop.xlane.xlu1 %3511 }
 0xb89   : > { %v3515_v24 = vadd.f32 1e-05, %v3513_v14  ;;  %v3514_v25 = vmul.f32 0.0078125, %v3512_v3 }
 0xb8b   : > { %4525 = vrsqrt.f32 %v3515_v24  ;;  %v3516_v26 = vadd.f32 1e-05, %v3514_v25 }
 0xb8d   : > { %4527 = vrsqrt.f32 %v3516_v26 }
 0xb95   : > { %v4526_v27 = vpop.eup %4525 }
 0xb96   : > { %v3519_v61 = vmul.f32 %v4526_v27, %v3505_v45 }
 0xb97   : > { %v4528_v29 = vpop.eup %4527 }
 0xb98   : > { %v3527_v31 = vmul.f32 %v4036_v28, %v3519_v61  ;;  %v3520_v32 = vmul.f32 %v4528_v29, %v3506_v20  ;;  %3542 = sbr.rel (%p4038_p1) target bundleno = 3288 (0xcd8), region = 132 }
 0xb9a   : > { %v3535_v33 = vadd.f32 %v4037_v30, %v3527_v31  ;;  %v3528_v34 = vmul.f32 %v4036_v28, %v3520_v32 }
 0xb9c   : > { %3537 = vst [vmem:[#allocation2] sm:$0xff] %v3535_v33  ;;  %v3536_v35 = vadd.f32 %v4037_v30, %v3528_v34  ;;  %3545 = vadd.xlane.f32.xlu0 (!%p4038_p1), %v3535_v33 }
 0xb9e   : > { %3538 = vst [vmem:[#allocation2 + $0x8] sm:$0xff] %v3536_v35 }
 0xba0   : > { %3547 = vadd.xlane.f32.xlu0 %v3536_v35 }
 0xc29   : > { %v3546_v36 = vpop.xlane.xlu0 %3545 }
 0xc2a   : > { %v3549_v42 = vmul.f32 0.0078125, %v3546_v36 }
 0xc2c   : > { %v3551_v44 = vsub.f32 %v3535_v33, %v3549_v42 }
 0xc2d   : > { %v3548_v41 = vpop.xlane.xlu0 %3547 }
 0xc2e   : > { %v3550_v43 = vmul.f32 0.0078125, %v3548_v41  ;;  %v3553_v46 = vmul.f32 %v3551_v44, %v3551_v44 }
 0xc30   : > { %v3552_v49 = vsub.f32 %v3536_v35, %v3550_v43  ;;  %3555 = vadd.xlane.f32.xlu1 %v3553_v46 }
 0xc32   : > { %v3554_v52 = vmul.f32 %v3552_v49, %v3552_v49 }
 0xc34   : > { %3557 = vadd.xlane.f32.xlu1 %v3554_v52 }
 0xcbd   : > { %v3556_v53 = vpop.xlane.xlu1 %3555 }
 0xcbe   : > { %v3559_v56 = vmul.f32 0.0078125, %v3556_v53 }
 0xcc0   : > { %v3561_v51 = vadd.f32 1e-05, %v3559_v56 }
 0xcc1   : > { %v3558_v58 = vpop.xlane.xlu1 %3557 }
 0xcc2   : > { %4531 = vrsqrt.f32 %v3561_v51  ;;  %v3560_v55 = vmul.f32 0.0078125, %v3558_v58 }
 0xcc4   : > { %v3562_v59 = vadd.f32 1e-05, %v3560_v55 }
 0xcc6   : > { %4533 = vrsqrt.f32 %v3562_v59 }
 0xccc   : > { %v4532_v60 = vpop.eup %4531 }
 0xccd   : > { %v3565_v57 = vmul.f32 %v4532_v60, %v3551_v44 }
 0xccf   : > { %v3573_v63 = vmul.f32 %v4039_v62, %v3565_v57 }
 0xcd0   : > { %v4534_v0 = vpop.eup %4533 }
 0xcd1   : > { %v3581_v1 = vadd.f32 %v4040_v47, %v3573_v63  ;;  %v3566_v2 = vmul.f32 %v4534_v0, %v3552_v49 }
 0xcd3   : > { %3583 = vst [vmem:[%s5523_s10] sm:$0xff] %v3581_v1  ;;  %v3574_v4 = vmul.f32 %v4039_v62, %v3566_v2 }
 0xcd5   : > { %v3582_v5 = vadd.f32 %v4040_v47, %v3574_v4 }
 0xcd7   : > { %3584 = vst [vmem:[%s5523_s10 + $0x8] sm:$0xff] %v3582_v5 }
 0xcd8 PF: > { %s6252_s13 = sld [smem:[#allocation27_spill]]  ;;  %s6253_s18 = sld [smem:[#allocation38_spill]] }
 0xcd9   : > { %s6254_s7 = sld [smem:[#allocation61_spill]]  ;;  %s3599_s3 = sshll.u32 %s5523_s10, 4  ;;  %s6009_s3 = int_to_ptr.vmem [resolvable:$true] %s3599_s3 }
 0xcda   : > { %s3586_s17 = scalar_lea.sflag [#allocation5], %s5437_s21  ;;  %s4745_s23 = scalar_lea.vmem %s6009_s3, 256 }
 0xcdb   : > { %p4746_p0 = scmp.ne.s32.totalorder %s6009_s3, %s4745_s23  ;;  %s4900_s16 = smov [#allocation15]  }
 0xcdc   : > { %s4749_s6 = sshll.u32 %s4900_s16, 4  ;;  %s4750_s6 = int_to_ptr.vmem [resolvable:$false] %s4749_s6 }
 0xcdd   : > { %s4751_s1 = scalar_lea.vmem %s4750_s6, 512  ;;  %p4752_p9 = scmp.lt.s32.totalorder %s6009_s3, %s4750_s6 }
 0xcde   : > { %s4053_s2 = sshll.u32 %s6252_s13, 8  ;;  %p6255_p5 = scmp.ne.s32.totalorder %s6253_s18, 0 }
 0xcdf   : > { %s6006_s11 = scalar_lea.hbm %s6254_s7, %s4053_s2  ;;  %p4753_p3 = scmp.lt.s32.totalorder %s4751_s1, %s4745_s23 }
 0xce0   : > { %p4747_p7 = pnand %p4746_p0, %p6255_p5 }
 0xce1   : > { %p4754_p12 = por %p4753_p3, %p4752_p9 }
 0xce2   : > { %p4748_p10 = pneg %p4747_p7 }
 0xce4   : > { %p4755_p13 = pnand %p4754_p12, %p4748_p10 }
 0xce6   : > { %4758 = shalt.err (!%p4755_p13)
}
 0xce7   : > { %s4759_s10 = scalar_lea.hbm %s6006_s11, 256  ;;  %s4763_s20 = scalar_lea.hbm %s6254_s7, 512 }
 0xce8   : > { %p4760_p8 = scmp.ne.s32.totalorder %s6006_s11, %s4759_s10  ;;  %p4764_p6 = scmp.lt.u32.totalorder %s6006_s11, %s6254_s7 }
 0xce9   : > { %p4765_p4 = scmp.lt.u32.totalorder %s4763_s20, %s4759_s10  ;;  %p4767_p0 = scmp.lt.u32.totalorder %s4759_s10, %s6006_s11 }
 0xcea   : > { %p4761_p11 = pnand %p4760_p8, %p6255_p5 }
 0xceb   : > { %p4766_p1 = por %p4765_p4, %p4764_p6 }
 0xcec   : > { %p4762_p2 = pneg %p4761_p11 }
 0xced   : > { %p4768_p7 = por %p4767_p0, %p4766_p1 }
 0xcef   : > { %p4769_p10 = pnand %p4768_p7, %p4762_p2 }
 0xcf1   : > { %4772 = shalt.err (!%p4769_p10)
}
 0xcf2   : > { %s4901_s5 = smov 128   ;;  %s4902_s24 = smov 8  }
 0xcf3   : > { %4270 = dma.vmem_to_hbm [thread:$0]  (%p6255_p5), %s6009_s3, 256, %s6006_s11, %s3586_s17, %s4901_s5, %s4901_s5, %s4902_s24  }
 0xcf4 PF: > { %s6256_s14 = sld [smem:[#allocation30_spill]]  ;;  %s6257_s28 = sld [smem:[#allocation23_spill]] }
 0xcf5   : > { %s6258_s9 = sld [smem:[#allocation40_spill]] }
 0xcfa   : > { %p4299_p9 = scmp.ge.s32.totalorder %s6256_s14, 2  ;;  %s3614_s4 = sand.u32 1, %s6257_s28  }
 0xcfb   : > { %p6259_p3 = scmp.ne.s32.totalorder %s6258_s9, 0  ;;  %s3615_s8 = scalar_lea.sflag [#allocation5], %s3614_s4 }
 0xcfd   : > { %p4295_p12 = pnand %p4299_p9, %p6259_p3 }
 0xcff   : > { %4834 = dma.done.wait (!%p4295_p12), %s3615_s8, 256  }
 0xd00   : > { %4836 = vsyncadd (!%p4295_p12), %s3615_s8, 4294967040  ;;  %s44_s3 = sadd.s32 1, %s6256_s14   ;;  %s6260_s0 = sld [smem:[#allocation21_spill]] }
 0xd01   : > { %p41_p13 = scmp.ge.s32.totalorder %s44_s3, 6   ;;  %s6261_s30 = sld [smem:[#allocation22_spill]] }
 0xd02   : > { %s6262_s20 = sld [smem:[#allocation32_spill]]  ;;  %s6263_s21 = sld [smem:[#allocation24_spill]] }
 0xd03   : > { %s6264_s1 = sld [smem:[#allocation25_spill]]  ;;  %s6265_s22 = sld [smem:[#allocation39_spill]] }
 0xd04   : > { %s6266_s2 = sld [smem:[#allocation28_spill]]  ;;  %s6267_s23 = sld [smem:[#allocation29_spill]] }
 0xd05   : > { %s6268_s24 = sld [smem:[#allocation31_spill]]  ;;  %s6269_s25 = sld [smem:[#allocation35_spill]] }
 0xd06   :  { %43 = sbr.rel (!%p41_p13) target bundleno = 36 (0x24), region = 251 }
 0xd0d   :  { %3620 = vsyncpa [#allocation4], 1 }
 0xd0e   :  { %3622 = vsyncpa [#allocation4 + $0x1], 1 }
 0xd0f   :  { %3623 = vsyncpa [#allocation7], 1 }
 0xd10   :  { %3625 = vsyncpa [#allocation7 + $0x1], 1 }
 0xd11   :  { %3626 = vsyncpa [#allocation10], 1 }
 0xd12   :  { %3628 = vsyncpa [#allocation10 + $0x1], 1 }
 0xd13   :  { %3629 = vsyncpa [#allocation13], 1 }
 0xd14   :  { %3631 = vsyncpa [#allocation13 + $0x1], 1 }
 0xd15   :  { %3632 = vsyncpa [#allocation5], 1 }
 0xd16   :  { %3634 = vsyncpa [#allocation5 + $0x1], 1 }

</bundles_post_ra>
